<compile_context>
chip_gen: v7x
topology: tpu7x:2x2x1
jax: 0.10.0
libtpu: 0.0.40
codegen_flags: <defaults>
</compile_context>

<pallas_src>
import jax
import jax.numpy as jnp
from jax.experimental import pallas as pl
from jax.experimental.pallas import tpu as pltpu

# ----------------------------- small ViT config ------------------------------
BATCH = 2
IMG = 28                 # multiple of 14
PATCH = 14
IN_CH = 3
EMBED_DIM = 32
NUM_HEADS = 4
HEAD_DIM = EMBED_DIM // NUM_HEADS
MLP_HIDDEN = 4 * EMBED_DIM
DEPTH = 2
NUM_REG = 4              # register tokens
GRID = IMG // PATCH
NUM_PATCHES = GRID * GRID
NUM_TOKENS = 1 + NUM_REG + NUM_PATCHES
LN_EPS = 1e-6            # DINOv2 uses LayerNorm(eps=1e-6)

_GELU_C = 0.7978845608028654   # sqrt(2/pi)
_NT_DIMS = (((1,), (1,)), ((), ()))   # contract last dims (q @ k^T without .T)


# ------------------------------ in-kernel helpers -----------------------------
def _ln(x, g, b):
    """One-pass LayerNorm (mean + mean-of-squares) in f32."""
    m = jnp.mean(x, axis=-1, keepdims=True)
    msq = jnp.mean(x * x, axis=-1, keepdims=True)
    var = jnp.maximum(msq - m * m, 0.0)
    return (x - m) * jax.lax.rsqrt(var + LN_EPS) * g + b


def _gelu_tanh(x):
    # tanh-form GELU: one EUP tanh + a few VPU ops (replaces the erf polynomial).
    # TODO(synk): PyTorch nn.GELU() is exact-erf; tanh form differs by ~1e-3 max.
    return 0.5 * x * (1.0 + jnp.tanh(_GELU_C * (x + 0.044715 * x * x * x)))


# ------------------------------- Pallas kernels ------------------------------
def _embed_kernel(patch_ref, pw_ref, pb_ref, clsp_ref, reg_ref, posp_ref, o_ref):
    """Patch-embed matmul + bias + pos-embed + cls/register assembly.

    One grid step = one batch element; writes the full (N, D) slab as ONE dense
    store (no sublane-masked partial stores).
    """
    f32 = jnp.float32
    tok = jnp.dot(patch_ref[0].astype(jnp.bfloat16), pw_ref[...],
                  preferred_element_type=f32) + pb_ref[...]             # (hw, D)
    slab = jnp.concatenate(
        [clsp_ref[...], reg_ref[...], tok + posp_ref[...]], axis=0)     # (N, D)
    o_ref[0] = slab.astype(o_ref.dtype)


def _blocks_kernel(x_ref,
                   n1_g, n1_b, qkv_w, qkv_b, proj_w, proj_b, ls1,
                   n2_g, n2_b, fc1_w, fc1_b, fc2_w, fc2_b, ls2,
                   fin_g, fin_b,
                   o_ref, tok_ref):
    """All DINOv2 blocks + final LayerNorm, depth streamed on grid axis 1.

    Grid = (batch, depth).  Token slab carried across depth in VMEM scratch.
    """
    f32 = jnp.float32
    bf16 = jnp.bfloat16
    D = EMBED_DIM
    d = pl.program_id(1)

    @pl.when(d == 0)
    def _():
        tok_ref[...] = x_ref[0].astype(f32)

    x = tok_ref[...]                                                    # (N, D) f32

    # ---- attention: LN1 -> fused qkv matmul -> MHSA -> proj -> LayerScale+res
    h = _ln(x, n1_g[0], n1_b[0])
    qkv = jnp.dot(h.astype(bf16), qkv_w[0],
                  preferred_element_type=f32) + qkv_b[0]                # (N, 3D)
    # 1/sqrt(head_dim) already folded into qkv_w / qkv_b q-columns.
    qb = qkv[:, :D].astype(bf16)
    kb = qkv[:, D:2 * D].astype(bf16)
    vb = qkv[:, 2 * D:].astype(bf16)

    # Lane masks built once per block (heads stay packed along lanes).
    lane = jax.lax.broadcasted_iota(jnp.int32, (1, D), 1)
    masks = [((lane >= hd * HEAD_DIM) & (lane < (hd + 1) * HEAD_DIM)).astype(bf16)
             for hd in range(NUM_HEADS)]

    attn = jnp.zeros(x.shape, f32)
    for hd in range(NUM_HEADS):
        kh = kb * masks[hd]                      # mask K only (restricts contraction)
        vh = vb * masks[hd]                      # mask V (restricts output lanes)
        s = jax.lax.dot_general(qb, kh, _NT_DIMS,
                                preferred_element_type=f32)             # (N, N)
        s = s - jnp.max(s, axis=-1, keepdims=True)
        p = jnp.exp(s)
        p = p * pl.reciprocal(jnp.sum(p, axis=-1, keepdims=True), approx=True)
        attn = attn + jnp.dot(p.astype(bf16), vh, preferred_element_type=f32)

    a = jnp.dot(attn.astype(bf16), proj_w[0],
                preferred_element_type=f32) + proj_b[0]
    x = x + ls1[0] * a                                                  # LayerScale + residual

    # ---- MLP: LN2 -> fc1 -> GELU(tanh) -> fc2 -> LayerScale + residual
    h = _ln(x, n2_g[0], n2_b[0])
    h = jnp.dot(h.astype(bf16), fc1_w[0],
                preferred_element_type=f32) + fc1_b[0]
    h = _gelu_tanh(h)
    h = jnp.dot(h.astype(bf16), fc2_w[0],
                preferred_element_type=f32) + fc2_b[0]
    x = x + ls2[0] * h

    tok_ref[...] = x

    @pl.when(d == pl.num_programs(1) - 1)
    def _():
        o_ref[0] = _ln(x, fin_g[...], fin_b[...]).astype(o_ref.dtype)


# ------------------------------ spec helpers ----------------------------------
def _const_spec(a):
    """Whole (small) array, same block for every grid step."""
    zeros = (0,) * a.ndim
    return pl.BlockSpec(a.shape, lambda *_: zeros)


def _depth_spec(a):
    """Depth-stacked weight: one per-block slab, streamed with the depth axis."""
    tail = (0,) * (a.ndim - 1)
    return pl.BlockSpec((1,) + a.shape[1:], lambda b, d: (d,) + tail)


# ------------------------------ kernel wrappers -------------------------------
def patchify(x):
    """NCHW image -> (B, h*w, C*p*p) with per-patch (c, kh, kw) ordering."""
    B, C, H, W = x.shape
    h, w = H // PATCH, W // PATCH
    x = x.reshape(B, C, h, PATCH, w, PATCH)
    x = x.transpose(0, 2, 4, 1, 3, 5)              # (B, h, w, C, p, p)
    return x.reshape(B, h * w, C * PATCH * PATCH), h, w


def embed_tokens(x_img, pk):
    """Fused patch-embed + cls/reg/pos assembly -> (B, N, D) token slab."""
    patches, gh, gw = patchify(x_img)
    B, hw, cpp = patches.shape
    D = EMBED_DIM
    N = 1 + NUM_REG + hw
    args = [pk["patch_w"], pk["patch_b"], pk["cls_pos"], pk["reg_tokens"],
            pk["pos_patch"]]
    out = pl.pallas_call(
        _embed_kernel,
        out_shape=jax.ShapeDtypeStruct((B, N, D), jnp.float32),
        grid=(B,),
        in_specs=[pl.BlockSpec((1, hw, cpp), lambda b: (b, 0, 0))]
                 + [_const_spec(a) for a in args],
        out_specs=pl.BlockSpec((1, N, D), lambda b: (b, 0, 0)),
        compiler_params=pltpu.CompilerParams(dimension_semantics=("parallel",)),
    )(patches, *args)
    return out, gh, gw


def fused_blocks(tokens, pk):
    """All transformer blocks + final LayerNorm in a single pallas_call."""
    B, N, D = tokens.shape
    tok_spec = pl.BlockSpec((1, N, D), lambda b, d: (b, 0, 0))
    stacked = [pk["n1_g"], pk["n1_b"], pk["qkv_w"], pk["qkv_b"],
               pk["proj_w"], pk["proj_b"], pk["ls1"],
               pk["n2_g"], pk["n2_b"], pk["fc1_w"], pk["fc1_b"],
               pk["fc2_w"], pk["fc2_b"], pk["ls2"]]
    final = [pk["norm_g"], pk["norm_b"]]
    return pl.pallas_call(
        _blocks_kernel,
        out_shape=jax.ShapeDtypeStruct((B, N, D), tokens.dtype),
        grid=(B, DEPTH),
        in_specs=[tok_spec]
                 + [_depth_spec(a) for a in stacked]
                 + [_const_spec(a) for a in final],
        out_specs=tok_spec,
        scratch_shapes=[pltpu.VMEM((N, D), jnp.float32)],
        compiler_params=pltpu.CompilerParams(
            dimension_semantics=("parallel", "arbitrary")),
    )(tokens, *stacked, *final)


# --------------------------------- model glue ---------------------------------
def dinov2_forward(x, packed):
    """Returns (features (B, D, H/14, W/14), class_token (B, D))."""
    B = x.shape[0]
    tokens, gh, gw = embed_tokens(x, packed)        # (B, N, D)
    tokens = fused_blocks(tokens, packed)           # (B, N, D), final LN applied
    cls_token = tokens[:, 0]                                           # (B, D)
    feats = tokens[:, 1 + NUM_REG:]                                    # (B, hw, D)
    feats = feats.reshape(B, gh, gw, EMBED_DIM).transpose(0, 3, 1, 2)  # (B, D, h, w)
    return feats, cls_token


# ------------------------ parameter packing (done once) -----------------------
def pack_params(params):
    """Stack per-block weights along depth, pre-cast matmul weights to bf16,
    fold 1/sqrt(head_dim) into the fused qkv weight/bias, fold pos[0] into cls."""
    D = EMBED_DIM
    bf16 = jnp.bfloat16
    scale = HEAD_DIM ** -0.5
    blocks = params["blocks"]

    def stack(fn):
        return jnp.stack([fn(b) for b in blocks], axis=0)

    # TODO(synk): bicubic pos-embed interpolation for non-native grid sizes not implemented.
    pos = params["pos_embed"][0]                    # (1 + hw, D), native resolution
    return {
        "patch_w": params["patch_w"].astype(bf16),
        "patch_b": params["patch_b"].reshape(1, D),
        "cls_pos": params["cls_token"].reshape(1, D) + pos[:1],
        "reg_tokens": params["reg_tokens"].reshape(NUM_REG, D),
        "pos_patch": pos[1:],
        "norm_g": params["norm_g"].reshape(1, D),
        "norm_b": params["norm_b"].reshape(1, D),
        "n1_g": stack(lambda b: b["n1_g"].reshape(1, D)),
        "n1_b": stack(lambda b: b["n1_b"].reshape(1, D)),
        "qkv_w": stack(lambda b: jnp.concatenate(
            [b["qkv_w"][:, :D] * scale, b["qkv_w"][:, D:]], axis=1)).astype(bf16),
        "qkv_b": stack(lambda b: jnp.concatenate(
            [b["qkv_b"][:D] * scale, b["qkv_b"][D:]]).reshape(1, 3 * D)),
        "proj_w": stack(lambda b: b["proj_w"]).astype(bf16),
        "proj_b": stack(lambda b: b["proj_b"].reshape(1, D)),
        "ls1": stack(lambda b: b["ls1"].reshape(1, D)),
        "n2_g": stack(lambda b: b["n2_g"].reshape(1, D)),
        "n2_b": stack(lambda b: b["n2_b"].reshape(1, D)),
        "fc1_w": stack(lambda b: b["fc1_w"]).astype(bf16),
        "fc1_b": stack(lambda b: b["fc1_b"].reshape(1, MLP_HIDDEN)),
        "fc2_w": stack(lambda b: b["fc2_w"]).astype(bf16),
        "fc2_b": stack(lambda b: b["fc2_b"].reshape(1, D)),
        "ls2": stack(lambda b: b["ls2"].reshape(1, D)),
    }


# ------------------------------ deterministic init ----------------------------
def init_params(key):
    ks = iter(jax.random.split(key, 16 + DEPTH * 16))

    def nrm(shape, s=0.02):
        return jax.random.normal(next(ks), shape, jnp.float32) * s

    params = {
        "patch_w": nrm((IN_CH * PATCH * PATCH, EMBED_DIM)),
        "patch_b": nrm((EMBED_DIM,)),
        "cls_token": nrm((1, 1, EMBED_DIM)),
        "reg_tokens": nrm((1, NUM_REG, EMBED_DIM)),
        "pos_embed": nrm((1, 1 + NUM_PATCHES, EMBED_DIM)),
        "norm_g": jnp.ones((EMBED_DIM,), jnp.float32),
        "norm_b": jnp.zeros((EMBED_DIM,), jnp.float32),
        "blocks": [],
    }
    for _ in range(DEPTH):
        params["blocks"].append({
            "n1_g": jnp.ones((EMBED_DIM,), jnp.float32),
            "n1_b": jnp.zeros((EMBED_DIM,), jnp.float32),
            "qkv_w": nrm((EMBED_DIM, 3 * EMBED_DIM)),
            "qkv_b": nrm((3 * EMBED_DIM,)),
            "proj_w": nrm((EMBED_DIM, EMBED_DIM)),
            "proj_b": nrm((EMBED_DIM,)),
            "ls1": jnp.ones((EMBED_DIM,), jnp.float32),   # DINOv2 LayerScale init_values=1.0
            "n2_g": jnp.ones((EMBED_DIM,), jnp.float32),
            "n2_b": jnp.zeros((EMBED_DIM,), jnp.float32),
            "fc1_w": nrm((EMBED_DIM, MLP_HIDDEN)),
            "fc1_b": nrm((MLP_HIDDEN,)),
            "fc2_w": nrm((MLP_HIDDEN, EMBED_DIM)),
            "fc2_b": nrm((EMBED_DIM,)),
            "ls2": jnp.ones((EMBED_DIM,), jnp.float32),
        })
    return params


# ------------------------------------ main ------------------------------------
if __name__ == "__main__":
    key = jax.random.PRNGKey(0)
    pkey, xkey = jax.random.split(key)
    params = init_params(pkey)
    packed = pack_params(params)                    # stack / bf16-cast once
    x = jax.random.normal(xkey, (BATCH, IN_CH, IMG, IMG), jnp.float32)

    feats, cls_tok = jax.jit(dinov2_forward)(x, packed)
    jax.block_until_ready((feats, cls_tok))

    assert feats.shape == (BATCH, EMBED_DIM, GRID, GRID), feats.shape
    assert cls_tok.shape == (BATCH, EMBED_DIM), cls_tok.shape
    assert feats.dtype == jnp.float32 and cls_tok.dtype == jnp.float32
    assert bool(jnp.all(jnp.isfinite(feats))) and bool(jnp.all(jnp.isfinite(cls_tok)))

    print("KERNEL_OK")
</pallas_src>

<mosaic_0001>
module attributes {stable_mosaic.version = 11 : i64} {
  func.func @_embed_kernel(%arg0: i32, %arg1: memref<1x4x588xf32, #tpu.memory_space<vmem>>, %arg2: memref<588x32xbf16, #tpu.memory_space<vmem>>, %arg3: memref<1x32xf32, #tpu.memory_space<vmem>>, %arg4: memref<1x32xf32, #tpu.memory_space<vmem>>, %arg5: memref<4x32xf32, #tpu.memory_space<vmem>>, %arg6: memref<4x32xf32, #tpu.memory_space<vmem>>, %arg7: memref<1x9x32xf32, #tpu.memory_space<vmem>>) attributes {dimension_semantics = [#tpu.dimension_semantics<parallel>], iteration_bounds = array<i64: 2>, scalar_prefetch = 0 : i64, scratch_operands = 0 : i64, tpu.core_type = #tpu.core_type<tc>, window_params = [{transform_indices = @transform_0, window_bounds = array<i64: 1, 4, 588>}, {pipeline_mode = #tpu.pipeline_mode<synchronous>, transform_indices = @transform_1, window_bounds = array<i64: 588, 32>}, {pipeline_mode = #tpu.pipeline_mode<synchronous>, transform_indices = @transform_2, window_bounds = array<i64: 1, 32>}, {pipeline_mode = #tpu.pipeline_mode<synchronous>, transform_indices = @transform_3, window_bounds = array<i64: 1, 32>}, {pipeline_mode = #tpu.pipeline_mode<synchronous>, transform_indices = @transform_4, window_bounds = array<i64: 4, 32>}, {pipeline_mode = #tpu.pipeline_mode<synchronous>, transform_indices = @transform_5, window_bounds = array<i64: 4, 32>}, {transform_indices = @transform_6, window_bounds = array<i64: 1, 9, 32>}]} {
    %c0 = arith.constant 0 : index
    %c0_0 = arith.constant 0 : index
    %c0_1 = arith.constant 0 : index
    %0 = vector.load %arg1[%c0, %c0_0, %c0_1] : memref<1x4x588xf32, #tpu.memory_space<vmem>>, vector<1x4x588xf32>
    %1 = vector.shape_cast %0 : vector<1x4x588xf32> to vector<4x588xf32>
    %2 = arith.truncf %1 : vector<4x588xf32> to vector<4x588xbf16>
    %c0_2 = arith.constant 0 : index
    %c0_3 = arith.constant 0 : index
    %3 = vector.load %arg2[%c0_2, %c0_3] : memref<588x32xbf16, #tpu.memory_space<vmem>>, vector<588x32xbf16>
    %cst = arith.constant dense<0.000000e+00> : vector<4x32xf32>
    %4 = tpu.matmul %2, %3, %cst {dimension_numbers = #tpu.dot_dimension_numbers<[1], [0], [0], [1], [0, 0, 1, 1], [], []>} : vector<4x588xbf16>, vector<588x32xbf16>, vector<4x32xf32> -> vector<4x32xf32>
    %c0_4 = arith.constant 0 : index
    %c0_5 = arith.constant 0 : index
    %5 = vector.load %arg3[%c0_4, %c0_5] : memref<1x32xf32, #tpu.memory_space<vmem>>, vector<1x32xf32>
    %6 = vector.broadcast %5 : vector<1x32xf32> to vector<4x32xf32>
    %7 = arith.addf %4, %6 : vector<4x32xf32>
    %c0_6 = arith.constant 0 : index
    %c0_7 = arith.constant 0 : index
    %8 = vector.load %arg4[%c0_6, %c0_7] : memref<1x32xf32, #tpu.memory_space<vmem>>, vector<1x32xf32>
    %c0_8 = arith.constant 0 : index
    %c0_9 = arith.constant 0 : index
    %9 = vector.load %arg5[%c0_8, %c0_9] : memref<4x32xf32, #tpu.memory_space<vmem>>, vector<4x32xf32>
    %c0_10 = arith.constant 0 : index
    %c0_11 = arith.constant 0 : index
    %10 = vector.load %arg6[%c0_10, %c0_11] : memref<4x32xf32, #tpu.memory_space<vmem>>, vector<4x32xf32>
    %11 = arith.addf %7, %10 : vector<4x32xf32>
    %12 = tpu.concatenate %8, %9, %11 in 0 : vector<1x32xf32>, vector<4x32xf32>, vector<4x32xf32> -> vector<9x32xf32>
    %c0_12 = arith.constant 0 : index
    %c0_13 = arith.constant 0 : index
    %c0_14 = arith.constant 0 : index
    %13 = vector.load %arg7[%c0_12, %c0_13, %c0_14] : memref<1x9x32xf32, #tpu.memory_space<vmem>>, vector<1x9x32xf32>
    %14 = vector.shape_cast %13 : vector<1x9x32xf32> to vector<9x32xf32>
    %15 = vector.shape_cast %12 : vector<9x32xf32> to vector<1x9x32xf32>
    tpu.vector_store %arg7[%c0_12, %c0_13, %c0_14], %15 {strides = array<i32>} : memref<1x9x32xf32, #tpu.memory_space<vmem>>, vector<1x9x32xf32>,
    return
  }
  func.func @transform_0(%arg0: i32) -> (i32, i32, i32) {
    %c0_i32 = arith.constant 0 : i32
    %c0_i32_0 = arith.constant 0 : i32
    %c0_i32_1 = arith.constant 0 : i32
    return %arg0, %c0_i32, %c0_i32_0 : i32, i32, i32
  }
  func.func @transform_1(%arg0: i32) -> (i32, i32) {
    %c0_i32 = arith.constant 0 : i32
    %c0_i32_0 = arith.constant 0 : i32
    %c0_i32_1 = arith.constant 0 : i32
    return %c0_i32, %c0_i32_0 : i32, i32
  }
  func.func @transform_2(%arg0: i32) -> (i32, i32) {
    %c0_i32 = arith.constant 0 : i32
    %c0_i32_0 = arith.constant 0 : i32
    %c0_i32_1 = arith.constant 0 : i32
    return %c0_i32, %c0_i32_0 : i32, i32
  }
  func.func @transform_3(%arg0: i32) -> (i32, i32) {
    %c0_i32 = arith.constant 0 : i32
    %c0_i32_0 = arith.constant 0 : i32
    %c0_i32_1 = arith.constant 0 : i32
    return %c0_i32, %c0_i32_0 : i32, i32
  }
  func.func @transform_4(%arg0: i32) -> (i32, i32) {
    %c0_i32 = arith.constant 0 : i32
    %c0_i32_0 = arith.constant 0 : i32
    %c0_i32_1 = arith.constant 0 : i32
    return %c0_i32, %c0_i32_0 : i32, i32
  }
  func.func @transform_5(%arg0: i32) -> (i32, i32) {
    %c0_i32 = arith.constant 0 : i32
    %c0_i32_0 = arith.constant 0 : i32
    %c0_i32_1 = arith.constant 0 : i32
    return %c0_i32, %c0_i32_0 : i32, i32
  }
  func.func @transform_6(%arg0: i32) -> (i32, i32, i32) {
    %c0_i32 = arith.constant 0 : i32
    %c0_i32_0 = arith.constant 0 : i32
    %c0_i32_1 = arith.constant 0 : i32
    return %arg0, %c0_i32, %c0_i32_0 : i32, i32, i32
  }
}

module attributes {stable_mosaic.version = 11 : i64} {
  func.func @_blocks_kernel(%arg0: i32, %arg1: i32, %arg2: memref<1x9x32xf32, #tpu.memory_space<vmem>>, %arg3: memref<1x1x32xf32, #tpu.memory_space<vmem>>, %arg4: memref<1x1x32xf32, #tpu.memory_space<vmem>>, %arg5: memref<1x32x96xbf16, #tpu.memory_space<vmem>>, %arg6: memref<1x1x96xf32, #tpu.memory_space<vmem>>, %arg7: memref<1x32x32xbf16, #tpu.memory_space<vmem>>, %arg8: memref<1x1x32xf32, #tpu.memory_space<vmem>>, %arg9: memref<1x1x32xf32, #tpu.memory_space<vmem>>, %arg10: memref<1x1x32xf32, #tpu.memory_space<vmem>>, %arg11: memref<1x1x32xf32, #tpu.memory_space<vmem>>, %arg12: memref<1x32x128xbf16, #tpu.memory_space<vmem>>, %arg13: memref<1x1x128xf32, #tpu.memory_space<vmem>>, %arg14: memref<1x128x32xbf16, #tpu.memory_space<vmem>>, %arg15: memref<1x1x32xf32, #tpu.memory_space<vmem>>, %arg16: memref<1x1x32xf32, #tpu.memory_space<vmem>>, %arg17: memref<1x32xf32, #tpu.memory_space<vmem>>, %arg18: memref<1x32xf32, #tpu.memory_space<vmem>>, %arg19: memref<1x9x32xf32, #tpu.memory_space<vmem>>, %arg20: memref<9x32xf32, #tpu.memory_space<vmem>>) attributes {dimension_semantics = [#tpu.dimension_semantics<parallel>, #tpu.dimension_semantics<arbitrary>], iteration_bounds = array<i64: 2, 2>, scalar_prefetch = 0 : i64, scratch_operands = 1 : i64, tpu.core_type = #tpu.core_type<tc>, window_params = [{transform_indices = @transform_0, window_bounds = array<i64: 1, 9, 32>}, {transform_indices = @transform_1, window_bounds = array<i64: 1, 1, 32>}, {transform_indices = @transform_2, window_bounds = array<i64: 1, 1, 32>}, {transform_indices = @transform_3, window_bounds = array<i64: 1, 32, 96>}, {transform_indices = @transform_4, window_bounds = array<i64: 1, 1, 96>}, {transform_indices = @transform_5, window_bounds = array<i64: 1, 32, 32>}, {transform_indices = @transform_6, window_bounds = array<i64: 1, 1, 32>}, {transform_indices = @transform_7, window_bounds = array<i64: 1, 1, 32>}, {transform_indices = @transform_8, window_bounds = array<i64: 1, 1, 32>}, {transform_indices = @transform_9, window_bounds = array<i64: 1, 1, 32>}, {transform_indices = @transform_10, window_bounds = array<i64: 1, 32, 128>}, {transform_indices = @transform_11, window_bounds = array<i64: 1, 1, 128>}, {transform_indices = @transform_12, window_bounds = array<i64: 1, 128, 32>}, {transform_indices = @transform_13, window_bounds = array<i64: 1, 1, 32>}, {transform_indices = @transform_14, window_bounds = array<i64: 1, 1, 32>}, {pipeline_mode = #tpu.pipeline_mode<synchronous>, transform_indices = @transform_15, window_bounds = array<i64: 1, 32>}, {pipeline_mode = #tpu.pipeline_mode<synchronous>, transform_indices = @transform_16, window_bounds = array<i64: 1, 32>}, {transform_indices = @transform_17, window_bounds = array<i64: 1, 9, 32>}]} {
    %c0_i32 = arith.constant 0 : i32
    %0 = arith.cmpi eq, %arg1, %c0_i32 : i32
    %1 = arith.extui %0 : i1 to i32
    %c0_i32_0 = arith.constant 0 : i32
    %2 = arith.cmpi ne, %1, %c0_i32_0 : i32
    scf.if %2 {
      %c0_87 = arith.constant 0 : index
      %c0_88 = arith.constant 0 : index
      %c0_89 = arith.constant 0 : index
      %231 = vector.load %arg2[%c0_87, %c0_88, %c0_89] : memref<1x9x32xf32, #tpu.memory_space<vmem>>, vector<1x9x32xf32>
      %232 = vector.shape_cast %231 : vector<1x9x32xf32> to vector<9x32xf32>
      %c0_90 = arith.constant 0 : index
      %c0_91 = arith.constant 0 : index
      %233 = vector.load %arg20[%c0_90, %c0_91] : memref<9x32xf32, #tpu.memory_space<vmem>>, vector<9x32xf32>
      tpu.vector_store %arg20[%c0_90, %c0_91], %232 {strides = array<i32>} : memref<9x32xf32, #tpu.memory_space<vmem>>, vector<9x32xf32>,
    } else {
    }
    %c0 = arith.constant 0 : index
    %c0_1 = arith.constant 0 : index
    %3 = vector.load %arg20[%c0, %c0_1] : memref<9x32xf32, #tpu.memory_space<vmem>>, vector<9x32xf32>
    %c0_2 = arith.constant 0 : index
    %c0_3 = arith.constant 0 : index
    %c0_4 = arith.constant 0 : index
    %4 = vector.load %arg3[%c0_2, %c0_3, %c0_4] : memref<1x1x32xf32, #tpu.memory_space<vmem>>, vector<1x1x32xf32>
    %5 = vector.shape_cast %4 : vector<1x1x32xf32> to vector<1x32xf32>
    %c0_5 = arith.constant 0 : index
    %c0_6 = arith.constant 0 : index
    %c0_7 = arith.constant 0 : index
    %6 = vector.load %arg4[%c0_5, %c0_6, %c0_7] : memref<1x1x32xf32, #tpu.memory_space<vmem>>, vector<1x1x32xf32>
    %7 = vector.shape_cast %6 : vector<1x1x32xf32> to vector<1x32xf32>
    %cst = arith.constant dense<0.000000e+00> : vector<9xf32>
    %8 = vector.multi_reduction <add>, %3, %cst [1] : vector<9x32xf32> to vector<9xf32>
    %9 = vector.shape_cast %8 : vector<9xf32> to vector<9x1xf32>
    %cst_8 = arith.constant 3.200000e+01 : f32
    %10 = vector.broadcast %cst_8 : f32 to vector<9x1xf32>
    %11 = arith.divf %9, %10 : vector<9x1xf32>
    %12 = arith.mulf %3, %3 : vector<9x32xf32>
    %cst_9 = arith.constant dense<0.000000e+00> : vector<9xf32>
    %13 = vector.multi_reduction <add>, %12, %cst_9 [1] : vector<9x32xf32> to vector<9xf32>
    %14 = vector.shape_cast %13 : vector<9xf32> to vector<9x1xf32>
    %cst_10 = arith.constant 3.200000e+01 : f32
    %15 = vector.broadcast %cst_10 : f32 to vector<9x1xf32>
    %16 = arith.divf %14, %15 : vector<9x1xf32>
    %17 = arith.mulf %11, %11 : vector<9x1xf32>
    %18 = arith.subf %16, %17 : vector<9x1xf32>
    %cst_11 = arith.constant 0.000000e+00 : f32
    %19 = vector.broadcast %cst_11 : f32 to vector<9x1xf32>
    %20 = arith.maximumf %18, %19 : vector<9x1xf32>
    %21 = vector.broadcast %11 : vector<9x1xf32> to vector<9x32xf32>
    %22 = arith.subf %3, %21 : vector<9x32xf32>
    %cst_12 = arith.constant 9.99999997E-7 : f32
    %23 = vector.broadcast %cst_12 : f32 to vector<9x1xf32>
    %24 = arith.addf %20, %23 : vector<9x1xf32>
    %25 = math.rsqrt %24 : vector<9x1xf32>
    %26 = vector.broadcast %25 : vector<9x1xf32> to vector<9x32xf32>
    %27 = arith.mulf %22, %26 : vector<9x32xf32>
    %28 = vector.broadcast %5 : vector<1x32xf32> to vector<9x32xf32>
    %29 = arith.mulf %27, %28 : vector<9x32xf32>
    %30 = vector.broadcast %7 : vector<1x32xf32> to vector<9x32xf32>
    %31 = arith.addf %29, %30 : vector<9x32xf32>
    %32 = arith.truncf %31 : vector<9x32xf32> to vector<9x32xbf16>
    %c0_13 = arith.constant 0 : index
    %c0_14 = arith.constant 0 : index
    %c0_15 = arith.constant 0 : index
    %33 = vector.load %arg5[%c0_13, %c0_14, %c0_15] : memref<1x32x96xbf16, #tpu.memory_space<vmem>>, vector<1x32x96xbf16>
    %34 = vector.shape_cast %33 : vector<1x32x96xbf16> to vector<32x96xbf16>
    %cst_16 = arith.constant dense<0.000000e+00> : vector<9x96xf32>
    %35 = tpu.matmul %32, %34, %cst_16 {dimension_numbers = #tpu.dot_dimension_numbers<[1], [0], [0], [1], [0, 0, 1, 1], [], []>} : vector<9x32xbf16>, vector<32x96xbf16>, vector<9x96xf32> -> vector<9x96xf32>
    %c0_17 = arith.constant 0 : index
    %c0_18 = arith.constant 0 : index
    %c0_19 = arith.constant 0 : index
    %36 = vector.load %arg6[%c0_17, %c0_18, %c0_19] : memref<1x1x96xf32, #tpu.memory_space<vmem>>, vector<1x1x96xf32>
    %37 = vector.shape_cast %36 : vector<1x1x96xf32> to vector<1x96xf32>
    %38 = vector.broadcast %37 : vector<1x96xf32> to vector<9x96xf32>
    %39 = arith.addf %35, %38 : vector<9x96xf32>
    %40 = vector.extract_strided_slice %39 {offsets = [0, 0], sizes = [9, 32], strides = [1, 1]} : vector<9x96xf32> to vector<9x32xf32>
    %41 = arith.truncf %40 : vector<9x32xf32> to vector<9x32xbf16>
    %42 = vector.extract_strided_slice %39 {offsets = [0, 32], sizes = [9, 32], strides = [1, 1]} : vector<9x96xf32> to vector<9x32xf32>
    %43 = arith.truncf %42 : vector<9x32xf32> to vector<9x32xbf16>
    %44 = vector.extract_strided_slice %39 {offsets = [0, 64], sizes = [9, 32], strides = [1, 1]} : vector<9x96xf32> to vector<9x32xf32>
    %45 = arith.truncf %44 : vector<9x32xf32> to vector<9x32xbf16>
    %46 = tpu.iota {dimensions = array<i32: 1>} : vector<1x32xi32>
    %c0_i32_20 = arith.constant 0 : i32
    %47 = vector.broadcast %c0_i32_20 : i32 to vector<1x32xi32>
    %48 = arith.cmpi sge, %46, %47 : vector<1x32xi32>
    %c8_i32 = arith.constant 8 : i32
    %49 = vector.broadcast %c8_i32 : i32 to vector<1x32xi32>
    %50 = arith.cmpi slt, %46, %49 : vector<1x32xi32>
    %51 = arith.andi %48, %50 : vector<1x32xi1>
    %52 = arith.extui %51 : vector<1x32xi1> to vector<1x32xi32>
    %53 = arith.sitofp %52 : vector<1x32xi32> to vector<1x32xf32>
    %54 = arith.truncf %53 : vector<1x32xf32> to vector<1x32xbf16>
    %c8_i32_21 = arith.constant 8 : i32
    %55 = vector.broadcast %c8_i32_21 : i32 to vector<1x32xi32>
    %56 = arith.cmpi sge, %46, %55 : vector<1x32xi32>
    %c16_i32 = arith.constant 16 : i32
    %57 = vector.broadcast %c16_i32 : i32 to vector<1x32xi32>
    %58 = arith.cmpi slt, %46, %57 : vector<1x32xi32>
    %59 = arith.andi %56, %58 : vector<1x32xi1>
    %60 = arith.extui %59 : vector<1x32xi1> to vector<1x32xi32>
    %61 = arith.sitofp %60 : vector<1x32xi32> to vector<1x32xf32>
    %62 = arith.truncf %61 : vector<1x32xf32> to vector<1x32xbf16>
    %c16_i32_22 = arith.constant 16 : i32
    %63 = vector.broadcast %c16_i32_22 : i32 to vector<1x32xi32>
    %64 = arith.cmpi sge, %46, %63 : vector<1x32xi32>
    %c24_i32 = arith.constant 24 : i32
    %65 = vector.broadcast %c24_i32 : i32 to vector<1x32xi32>
    %66 = arith.cmpi slt, %46, %65 : vector<1x32xi32>
    %67 = arith.andi %64, %66 : vector<1x32xi1>
    %68 = arith.extui %67 : vector<1x32xi1> to vector<1x32xi32>
    %69 = arith.sitofp %68 : vector<1x32xi32> to vector<1x32xf32>
    %70 = arith.truncf %69 : vector<1x32xf32> to vector<1x32xbf16>
    %c24_i32_23 = arith.constant 24 : i32
    %71 = vector.broadcast %c24_i32_23 : i32 to vector<1x32xi32>
    %72 = arith.cmpi sge, %46, %71 : vector<1x32xi32>
    %c32_i32 = arith.constant 32 : i32
    %73 = vector.broadcast %c32_i32 : i32 to vector<1x32xi32>
    %74 = arith.cmpi slt, %46, %73 : vector<1x32xi32>
    %75 = arith.andi %72, %74 : vector<1x32xi1>
    %76 = arith.extui %75 : vector<1x32xi1> to vector<1x32xi32>
    %77 = arith.sitofp %76 : vector<1x32xi32> to vector<1x32xf32>
    %78 = arith.truncf %77 : vector<1x32xf32> to vector<1x32xbf16>
    %cst_24 = arith.constant 0.000000e+00 : f32
    %79 = vector.broadcast %cst_24 : f32 to vector<9x32xf32>
    %80 = vector.broadcast %54 : vector<1x32xbf16> to vector<9x32xbf16>
    %81 = arith.mulf %43, %80 : vector<9x32xbf16>
    %82 = vector.broadcast %54 : vector<1x32xbf16> to vector<9x32xbf16>
    %83 = arith.mulf %45, %82 : vector<9x32xbf16>
    %cst_25 = arith.constant dense<0.000000e+00> : vector<9x9xf32>
    %84 = tpu.matmul %41, %81, %cst_25 {dimension_numbers = #tpu.dot_dimension_numbers<[1], [1], [0], [0], [0, 0, 1, 0], [], []>} : vector<9x32xbf16>, vector<9x32xbf16>, vector<9x9xf32> -> vector<9x9xf32>
    %cst_26 = arith.constant dense<0xFF800000> : vector<9xf32>
    %85 = vector.multi_reduction <maximumf>, %84, %cst_26 [1] : vector<9x9xf32> to vector<9xf32>
    %86 = vector.shape_cast %85 : vector<9xf32> to vector<9x1xf32>
    %87 = vector.broadcast %86 : vector<9x1xf32> to vector<9x9xf32>
    %88 = arith.subf %84, %87 : vector<9x9xf32>
    %89 = math.exp %88 : vector<9x9xf32>
    %cst_27 = arith.constant dense<0.000000e+00> : vector<9xf32>
    %90 = vector.multi_reduction <add>, %89, %cst_27 [1] : vector<9x9xf32> to vector<9xf32>
    %91 = vector.shape_cast %90 : vector<9xf32> to vector<9x1xf32>
    %92 = tpu.reciprocal %91 {approx = true} : vector<9x1xf32> -> vector<9x1xf32>
    %93 = vector.broadcast %92 : vector<9x1xf32> to vector<9x9xf32>
    %94 = arith.mulf %89, %93 : vector<9x9xf32>
    %95 = arith.truncf %94 : vector<9x9xf32> to vector<9x9xbf16>
    %cst_28 = arith.constant dense<0.000000e+00> : vector<9x32xf32>
    %96 = tpu.matmul %95, %83, %cst_28 {dimension_numbers = #tpu.dot_dimension_numbers<[1], [0], [0], [1], [0, 0, 1, 1], [], []>} : vector<9x9xbf16>, vector<9x32xbf16>, vector<9x32xf32> -> vector<9x32xf32>
    %97 = arith.addf %79, %96 : vector<9x32xf32>
    %98 = vector.broadcast %62 : vector<1x32xbf16> to vector<9x32xbf16>
    %99 = arith.mulf %43, %98 : vector<9x32xbf16>
    %100 = vector.broadcast %62 : vector<1x32xbf16> to vector<9x32xbf16>
    %101 = arith.mulf %45, %100 : vector<9x32xbf16>
    %cst_29 = arith.constant dense<0.000000e+00> : vector<9x9xf32>
    %102 = tpu.matmul %41, %99, %cst_29 {dimension_numbers = #tpu.dot_dimension_numbers<[1], [1], [0], [0], [0, 0, 1, 0], [], []>} : vector<9x32xbf16>, vector<9x32xbf16>, vector<9x9xf32> -> vector<9x9xf32>
    %cst_30 = arith.constant dense<0xFF800000> : vector<9xf32>
    %103 = vector.multi_reduction <maximumf>, %102, %cst_30 [1] : vector<9x9xf32> to vector<9xf32>
    %104 = vector.shape_cast %103 : vector<9xf32> to vector<9x1xf32>
    %105 = vector.broadcast %104 : vector<9x1xf32> to vector<9x9xf32>
    %106 = arith.subf %102, %105 : vector<9x9xf32>
    %107 = math.exp %106 : vector<9x9xf32>
    %cst_31 = arith.constant dense<0.000000e+00> : vector<9xf32>
    %108 = vector.multi_reduction <add>, %107, %cst_31 [1] : vector<9x9xf32> to vector<9xf32>
    %109 = vector.shape_cast %108 : vector<9xf32> to vector<9x1xf32>
    %110 = tpu.reciprocal %109 {approx = true} : vector<9x1xf32> -> vector<9x1xf32>
    %111 = vector.broadcast %110 : vector<9x1xf32> to vector<9x9xf32>
    %112 = arith.mulf %107, %111 : vector<9x9xf32>
    %113 = arith.truncf %112 : vector<9x9xf32> to vector<9x9xbf16>
    %cst_32 = arith.constant dense<0.000000e+00> : vector<9x32xf32>
    %114 = tpu.matmul %113, %101, %cst_32 {dimension_numbers = #tpu.dot_dimension_numbers<[1], [0], [0], [1], [0, 0, 1, 1], [], []>} : vector<9x9xbf16>, vector<9x32xbf16>, vector<9x32xf32> -> vector<9x32xf32>
    %115 = arith.addf %97, %114 : vector<9x32xf32>
    %116 = vector.broadcast %70 : vector<1x32xbf16> to vector<9x32xbf16>
    %117 = arith.mulf %43, %116 : vector<9x32xbf16>
    %118 = vector.broadcast %70 : vector<1x32xbf16> to vector<9x32xbf16>
    %119 = arith.mulf %45, %118 : vector<9x32xbf16>
    %cst_33 = arith.constant dense<0.000000e+00> : vector<9x9xf32>
    %120 = tpu.matmul %41, %117, %cst_33 {dimension_numbers = #tpu.dot_dimension_numbers<[1], [1], [0], [0], [0, 0, 1, 0], [], []>} : vector<9x32xbf16>, vector<9x32xbf16>, vector<9x9xf32> -> vector<9x9xf32>
    %cst_34 = arith.constant dense<0xFF800000> : vector<9xf32>
    %121 = vector.multi_reduction <maximumf>, %120, %cst_34 [1] : vector<9x9xf32> to vector<9xf32>
    %122 = vector.shape_cast %121 : vector<9xf32> to vector<9x1xf32>
    %123 = vector.broadcast %122 : vector<9x1xf32> to vector<9x9xf32>
    %124 = arith.subf %120, %123 : vector<9x9xf32>
    %125 = math.exp %124 : vector<9x9xf32>
    %cst_35 = arith.constant dense<0.000000e+00> : vector<9xf32>
    %126 = vector.multi_reduction <add>, %125, %cst_35 [1] : vector<9x9xf32> to vector<9xf32>
    %127 = vector.shape_cast %126 : vector<9xf32> to vector<9x1xf32>
    %128 = tpu.reciprocal %127 {approx = true} : vector<9x1xf32> -> vector<9x1xf32>
    %129 = vector.broadcast %128 : vector<9x1xf32> to vector<9x9xf32>
    %130 = arith.mulf %125, %129 : vector<9x9xf32>
    %131 = arith.truncf %130 : vector<9x9xf32> to vector<9x9xbf16>
    %cst_36 = arith.constant dense<0.000000e+00> : vector<9x32xf32>
    %132 = tpu.matmul %131, %119, %cst_36 {dimension_numbers = #tpu.dot_dimension_numbers<[1], [0], [0], [1], [0, 0, 1, 1], [], []>} : vector<9x9xbf16>, vector<9x32xbf16>, vector<9x32xf32> -> vector<9x32xf32>
    %133 = arith.addf %115, %132 : vector<9x32xf32>
    %134 = vector.broadcast %78 : vector<1x32xbf16> to vector<9x32xbf16>
    %135 = arith.mulf %43, %134 : vector<9x32xbf16>
    %136 = vector.broadcast %78 : vector<1x32xbf16> to vector<9x32xbf16>
    %137 = arith.mulf %45, %136 : vector<9x32xbf16>
    %cst_37 = arith.constant dense<0.000000e+00> : vector<9x9xf32>
    %138 = tpu.matmul %41, %135, %cst_37 {dimension_numbers = #tpu.dot_dimension_numbers<[1], [1], [0], [0], [0, 0, 1, 0], [], []>} : vector<9x32xbf16>, vector<9x32xbf16>, vector<9x9xf32> -> vector<9x9xf32>
    %cst_38 = arith.constant dense<0xFF800000> : vector<9xf32>
    %139 = vector.multi_reduction <maximumf>, %138, %cst_38 [1] : vector<9x9xf32> to vector<9xf32>
    %140 = vector.shape_cast %139 : vector<9xf32> to vector<9x1xf32>
    %141 = vector.broadcast %140 : vector<9x1xf32> to vector<9x9xf32>
    %142 = arith.subf %138, %141 : vector<9x9xf32>
    %143 = math.exp %142 : vector<9x9xf32>
    %cst_39 = arith.constant dense<0.000000e+00> : vector<9xf32>
    %144 = vector.multi_reduction <add>, %143, %cst_39 [1] : vector<9x9xf32> to vector<9xf32>
    %145 = vector.shape_cast %144 : vector<9xf32> to vector<9x1xf32>
    %146 = tpu.reciprocal %145 {approx = true} : vector<9x1xf32> -> vector<9x1xf32>
    %147 = vector.broadcast %146 : vector<9x1xf32> to vector<9x9xf32>
    %148 = arith.mulf %143, %147 : vector<9x9xf32>
    %149 = arith.truncf %148 : vector<9x9xf32> to vector<9x9xbf16>
    %cst_40 = arith.constant dense<0.000000e+00> : vector<9x32xf32>
    %150 = tpu.matmul %149, %137, %cst_40 {dimension_numbers = #tpu.dot_dimension_numbers<[1], [0], [0], [1], [0, 0, 1, 1], [], []>} : vector<9x9xbf16>, vector<9x32xbf16>, vector<9x32xf32> -> vector<9x32xf32>
    %151 = arith.addf %133, %150 : vector<9x32xf32>
    %152 = arith.truncf %151 : vector<9x32xf32> to vector<9x32xbf16>
    %c0_41 = arith.constant 0 : index
    %c0_42 = arith.constant 0 : index
    %c0_43 = arith.constant 0 : index
    %153 = vector.load %arg7[%c0_41, %c0_42, %c0_43] : memref<1x32x32xbf16, #tpu.memory_space<vmem>>, vector<1x32x32xbf16>
    %154 = vector.shape_cast %153 : vector<1x32x32xbf16> to vector<32x32xbf16>
    %cst_44 = arith.constant dense<0.000000e+00> : vector<9x32xf32>
    %155 = tpu.matmul %152, %154, %cst_44 {dimension_numbers = #tpu.dot_dimension_numbers<[1], [0], [0], [1], [0, 0, 1, 1], [], []>} : vector<9x32xbf16>, vector<32x32xbf16>, vector<9x32xf32> -> vector<9x32xf32>
    %c0_45 = arith.constant 0 : index
    %c0_46 = arith.constant 0 : index
    %c0_47 = arith.constant 0 : index
    %156 = vector.load %arg8[%c0_45, %c0_46, %c0_47] : memref<1x1x32xf32, #tpu.memory_space<vmem>>, vector<1x1x32xf32>
    %157 = vector.shape_cast %156 : vector<1x1x32xf32> to vector<1x32xf32>
    %158 = vector.broadcast %157 : vector<1x32xf32> to vector<9x32xf32>
    %159 = arith.addf %155, %158 : vector<9x32xf32>
    %c0_48 = arith.constant 0 : index
    %c0_49 = arith.constant 0 : index
    %c0_50 = arith.constant 0 : index
    %160 = vector.load %arg9[%c0_48, %c0_49, %c0_50] : memref<1x1x32xf32, #tpu.memory_space<vmem>>, vector<1x1x32xf32>
    %161 = vector.shape_cast %160 : vector<1x1x32xf32> to vector<1x32xf32>
    %162 = vector.broadcast %161 : vector<1x32xf32> to vector<9x32xf32>
    %163 = arith.mulf %162, %159 : vector<9x32xf32>
    %164 = arith.addf %3, %163 : vector<9x32xf32>
    %c0_51 = arith.constant 0 : index
    %c0_52 = arith.constant 0 : index
    %c0_53 = arith.constant 0 : index
    %165 = vector.load %arg10[%c0_51, %c0_52, %c0_53] : memref<1x1x32xf32, #tpu.memory_space<vmem>>, vector<1x1x32xf32>
    %166 = vector.shape_cast %165 : vector<1x1x32xf32> to vector<1x32xf32>
    %c0_54 = arith.constant 0 : index
    %c0_55 = arith.constant 0 : index
    %c0_56 = arith.constant 0 : index
    %167 = vector.load %arg11[%c0_54, %c0_55, %c0_56] : memref<1x1x32xf32, #tpu.memory_space<vmem>>, vector<1x1x32xf32>
    %168 = vector.shape_cast %167 : vector<1x1x32xf32> to vector<1x32xf32>
    %cst_57 = arith.constant dense<0.000000e+00> : vector<9xf32>
    %169 = vector.multi_reduction <add>, %164, %cst_57 [1] : vector<9x32xf32> to vector<9xf32>
    %170 = vector.shape_cast %169 : vector<9xf32> to vector<9x1xf32>
    %cst_58 = arith.constant 3.200000e+01 : f32
    %171 = vector.broadcast %cst_58 : f32 to vector<9x1xf32>
    %172 = arith.divf %170, %171 : vector<9x1xf32>
    %173 = arith.mulf %164, %164 : vector<9x32xf32>
    %cst_59 = arith.constant dense<0.000000e+00> : vector<9xf32>
    %174 = vector.multi_reduction <add>, %173, %cst_59 [1] : vector<9x32xf32> to vector<9xf32>
    %175 = vector.shape_cast %174 : vector<9xf32> to vector<9x1xf32>
    %cst_60 = arith.constant 3.200000e+01 : f32
    %176 = vector.broadcast %cst_60 : f32 to vector<9x1xf32>
    %177 = arith.divf %175, %176 : vector<9x1xf32>
    %178 = arith.mulf %172, %172 : vector<9x1xf32>
    %179 = arith.subf %177, %178 : vector<9x1xf32>
    %cst_61 = arith.constant 0.000000e+00 : f32
    %180 = vector.broadcast %cst_61 : f32 to vector<9x1xf32>
    %181 = arith.maximumf %179, %180 : vector<9x1xf32>
    %182 = vector.broadcast %172 : vector<9x1xf32> to vector<9x32xf32>
    %183 = arith.subf %164, %182 : vector<9x32xf32>
    %cst_62 = arith.constant 9.99999997E-7 : f32
    %184 = vector.broadcast %cst_62 : f32 to vector<9x1xf32>
    %185 = arith.addf %181, %184 : vector<9x1xf32>
    %186 = math.rsqrt %185 : vector<9x1xf32>
    %187 = vector.broadcast %186 : vector<9x1xf32> to vector<9x32xf32>
    %188 = arith.mulf %183, %187 : vector<9x32xf32>
    %189 = vector.broadcast %166 : vector<1x32xf32> to vector<9x32xf32>
    %190 = arith.mulf %188, %189 : vector<9x32xf32>
    %191 = vector.broadcast %168 : vector<1x32xf32> to vector<9x32xf32>
    %192 = arith.addf %190, %191 : vector<9x32xf32>
    %193 = arith.truncf %192 : vector<9x32xf32> to vector<9x32xbf16>
    %c0_63 = arith.constant 0 : index
    %c0_64 = arith.constant 0 : index
    %c0_65 = arith.constant 0 : index
    %194 = vector.load %arg12[%c0_63, %c0_64, %c0_65] : memref<1x32x128xbf16, #tpu.memory_space<vmem>>, vector<1x32x128xbf16>
    %195 = vector.shape_cast %194 : vector<1x32x128xbf16> to vector<32x128xbf16>
    %cst_66 = arith.constant dense<0.000000e+00> : vector<9x128xf32>
    %196 = tpu.matmul %193, %195, %cst_66 {dimension_numbers = #tpu.dot_dimension_numbers<[1], [0], [0], [1], [0, 0, 1, 1], [], []>} : vector<9x32xbf16>, vector<32x128xbf16>, vector<9x128xf32> -> vector<9x128xf32>
    %c0_67 = arith.constant 0 : index
    %c0_68 = arith.constant 0 : index
    %c0_69 = arith.constant 0 : index
    %197 = vector.load %arg13[%c0_67, %c0_68, %c0_69] : memref<1x1x128xf32, #tpu.memory_space<vmem>>, vector<1x1x128xf32>
    %198 = vector.shape_cast %197 : vector<1x1x128xf32> to vector<1x128xf32>
    %199 = vector.broadcast %198 : vector<1x128xf32> to vector<9x128xf32>
    %200 = arith.addf %196, %199 : vector<9x128xf32>
    %cst_70 = arith.constant 5.000000e-01 : f32
    %201 = vector.broadcast %cst_70 : f32 to vector<9x128xf32>
    %202 = arith.mulf %201, %200 : vector<9x128xf32>
    %cst_71 = arith.constant 4.471500e-02 : f32
    %203 = vector.broadcast %cst_71 : f32 to vector<9x128xf32>
    %204 = arith.mulf %203, %200 : vector<9x128xf32>
    %205 = arith.mulf %204, %200 : vector<9x128xf32>
    %206 = arith.mulf %205, %200 : vector<9x128xf32>
    %207 = arith.addf %200, %206 : vector<9x128xf32>
    %cst_72 = arith.constant 0.797884583 : f32
    %208 = vector.broadcast %cst_72 : f32 to vector<9x128xf32>
    %209 = arith.mulf %208, %207 : vector<9x128xf32>
    %210 = math.tanh %209 : vector<9x128xf32>
    %cst_73 = arith.constant 1.000000e+00 : f32
    %211 = vector.broadcast %cst_73 : f32 to vector<9x128xf32>
    %212 = arith.addf %211, %210 : vector<9x128xf32>
    %213 = arith.mulf %202, %212 : vector<9x128xf32>
    %214 = arith.truncf %213 : vector<9x128xf32> to vector<9x128xbf16>
    %c0_74 = arith.constant 0 : index
    %c0_75 = arith.constant 0 : index
    %c0_76 = arith.constant 0 : index
    %215 = vector.load %arg14[%c0_74, %c0_75, %c0_76] : memref<1x128x32xbf16, #tpu.memory_space<vmem>>, vector<1x128x32xbf16>
    %216 = vector.shape_cast %215 : vector<1x128x32xbf16> to vector<128x32xbf16>
    %cst_77 = arith.constant dense<0.000000e+00> : vector<9x32xf32>
    %217 = tpu.matmul %214, %216, %cst_77 {dimension_numbers = #tpu.dot_dimension_numbers<[1], [0], [0], [1], [0, 0, 1, 1], [], []>} : vector<9x128xbf16>, vector<128x32xbf16>, vector<9x32xf32> -> vector<9x32xf32>
    %c0_78 = arith.constant 0 : index
    %c0_79 = arith.constant 0 : index
    %c0_80 = arith.constant 0 : index
    %218 = vector.load %arg15[%c0_78, %c0_79, %c0_80] : memref<1x1x32xf32, #tpu.memory_space<vmem>>, vector<1x1x32xf32>
    %219 = vector.shape_cast %218 : vector<1x1x32xf32> to vector<1x32xf32>
    %220 = vector.broadcast %219 : vector<1x32xf32> to vector<9x32xf32>
    %221 = arith.addf %217, %220 : vector<9x32xf32>
    %c0_81 = arith.constant 0 : index
    %c0_82 = arith.constant 0 : index
    %c0_83 = arith.constant 0 : index
    %222 = vector.load %arg16[%c0_81, %c0_82, %c0_83] : memref<1x1x32xf32, #tpu.memory_space<vmem>>, vector<1x1x32xf32>
    %223 = vector.shape_cast %222 : vector<1x1x32xf32> to vector<1x32xf32>
    %224 = vector.broadcast %223 : vector<1x32xf32> to vector<9x32xf32>
    %225 = arith.mulf %224, %221 : vector<9x32xf32>
    %226 = arith.addf %164, %225 : vector<9x32xf32>
    %c0_84 = arith.constant 0 : index
    %c0_85 = arith.constant 0 : index
    %227 = vector.load %arg20[%c0_84, %c0_85] : memref<9x32xf32, #tpu.memory_space<vmem>>, vector<9x32xf32>
    tpu.vector_store %arg20[%c0_84, %c0_85], %226 {strides = array<i32>} : memref<9x32xf32, #tpu.memory_space<vmem>>, vector<9x32xf32>,
    %c1_i32 = arith.constant 1 : i32
    %228 = arith.cmpi eq, %arg1, %c1_i32 : i32
    %229 = arith.extui %228 : i1 to i32
    %c0_i32_86 = arith.constant 0 : i32
    %230 = arith.cmpi ne, %229, %c0_i32_86 : i32
    scf.if %230 {
      %c0_87 = arith.constant 0 : index
      %c0_88 = arith.constant 0 : index
      %231 = vector.load %arg17[%c0_87, %c0_88] : memref<1x32xf32, #tpu.memory_space<vmem>>, vector<1x32xf32>
      %c0_89 = arith.constant 0 : index
      %c0_90 = arith.constant 0 : index
      %232 = vector.load %arg18[%c0_89, %c0_90] : memref<1x32xf32, #tpu.memory_space<vmem>>, vector<1x32xf32>
      %cst_91 = arith.constant dense<0.000000e+00> : vector<9xf32>
      %233 = vector.multi_reduction <add>, %226, %cst_91 [1] : vector<9x32xf32> to vector<9xf32>
      %234 = vector.shape_cast %233 : vector<9xf32> to vector<9x1xf32>
      %cst_92 = arith.constant 3.200000e+01 : f32
      %235 = vector.broadcast %cst_92 : f32 to vector<9x1xf32>
      %236 = arith.divf %234, %235 : vector<9x1xf32>
      %237 = arith.mulf %226, %226 : vector<9x32xf32>
      %cst_93 = arith.constant dense<0.000000e+00> : vector<9xf32>
      %238 = vector.multi_reduction <add>, %237, %cst_93 [1] : vector<9x32xf32> to vector<9xf32>
      %239 = vector.shape_cast %238 : vector<9xf32> to vector<9x1xf32>
      %cst_94 = arith.constant 3.200000e+01 : f32
      %240 = vector.broadcast %cst_94 : f32 to vector<9x1xf32>
      %241 = arith.divf %239, %240 : vector<9x1xf32>
      %242 = arith.mulf %236, %236 : vector<9x1xf32>
      %243 = arith.subf %241, %242 : vector<9x1xf32>
      %cst_95 = arith.constant 0.000000e+00 : f32
      %244 = vector.broadcast %cst_95 : f32 to vector<9x1xf32>
      %245 = arith.maximumf %243, %244 : vector<9x1xf32>
      %246 = vector.broadcast %236 : vector<9x1xf32> to vector<9x32xf32>
      %247 = arith.subf %226, %246 : vector<9x32xf32>
      %cst_96 = arith.constant 9.99999997E-7 : f32
      %248 = vector.broadcast %cst_96 : f32 to vector<9x1xf32>
      %249 = arith.addf %245, %248 : vector<9x1xf32>
      %250 = math.rsqrt %249 : vector<9x1xf32>
      %251 = vector.broadcast %250 : vector<9x1xf32> to vector<9x32xf32>
      %252 = arith.mulf %247, %251 : vector<9x32xf32>
      %253 = vector.broadcast %231 : vector<1x32xf32> to vector<9x32xf32>
      %254 = arith.mulf %252, %253 : vector<9x32xf32>
      %255 = vector.broadcast %232 : vector<1x32xf32> to vector<9x32xf32>
      %256 = arith.addf %254, %255 : vector<9x32xf32>
      %c0_97 = arith.constant 0 : index
      %c0_98 = arith.constant 0 : index
      %c0_99 = arith.constant 0 : index
      %257 = vector.load %arg19[%c0_97, %c0_98, %c0_99] : memref<1x9x32xf32, #tpu.memory_space<vmem>>, vector<1x9x32xf32>
      %258 = vector.shape_cast %257 : vector<1x9x32xf32> to vector<9x32xf32>
      %259 = vector.shape_cast %256 : vector<9x32xf32> to vector<1x9x32xf32>
      tpu.vector_store %arg19[%c0_97, %c0_98, %c0_99], %259 {strides = array<i32>} : memref<1x9x32xf32, #tpu.memory_space<vmem>>, vector<1x9x32xf32>,
    } else {
    }
    return
  }
  func.func @transform_0(%arg0: i32, %arg1: i32) -> (i32, i32, i32) {
    %c0_i32 = arith.constant 0 : i32
    %c0_i32_0 = arith.constant 0 : i32
    %c0_i32_1 = arith.constant 0 : i32
    return %arg0, %c0_i32, %c0_i32_0 : i32, i32, i32
  }
  func.func @transform_1(%arg0: i32, %arg1: i32) -> (i32, i32, i32) {
    %c0_i32 = arith.constant 0 : i32
    %c0_i32_0 = arith.constant 0 : i32
    %c0_i32_1 = arith.constant 0 : i32
    return %arg1, %c0_i32, %c0_i32_0 : i32, i32, i32
  }
  func.func @transform_2(%arg0: i32, %arg1: i32) -> (i32, i32, i32) {
    %c0_i32 = arith.constant 0 : i32
    %c0_i32_0 = arith.constant 0 : i32
    %c0_i32_1 = arith.constant 0 : i32
    return %arg1, %c0_i32, %c0_i32_0 : i32, i32, i32
  }
  func.func @transform_3(%arg0: i32, %arg1: i32) -> (i32, i32, i32) {
    %c0_i32 = arith.constant 0 : i32
    %c0_i32_0 = arith.constant 0 : i32
    %c0_i32_1 = arith.constant 0 : i32
    return %arg1, %c0_i32, %c0_i32_0 : i32, i32, i32
  }
  func.func @transform_4(%arg0: i32, %arg1: i32) -> (i32, i32, i32) {
    %c0_i32 = arith.constant 0 : i32
    %c0_i32_0 = arith.constant 0 : i32
    %c0_i32_1 = arith.constant 0 : i32
    return %arg1, %c0_i32, %c0_i32_0 : i32, i32, i32
  }
  func.func @transform_5(%arg0: i32, %arg1: i32) -> (i32, i32, i32) {
    %c0_i32 = arith.constant 0 : i32
    %c0_i32_0 = arith.constant 0 : i32
    %c0_i32_1 = arith.constant 0 : i32
    return %arg1, %c0_i32, %c0_i32_0 : i32, i32, i32
  }
  func.func @transform_6(%arg0: i32, %arg1: i32) -> (i32, i32, i32) {
    %c0_i32 = arith.constant 0 : i32
    %c0_i32_0 = arith.constant 0 : i32
    %c0_i32_1 = arith.constant 0 : i32
    return %arg1, %c0_i32, %c0_i32_0 : i32, i32, i32
  }
  func.func @transform_7(%arg0: i32, %arg1: i32) -> (i32, i32, i32) {
    %c0_i32 = arith.constant 0 : i32
    %c0_i32_0 = arith.constant 0 : i32
    %c0_i32_1 = arith.constant 0 : i32
    return %arg1, %c0_i32, %c0_i32_0 : i32, i32, i32
  }
  func.func @transform_8(%arg0: i32, %arg1: i32) -> (i32, i32, i32) {
    %c0_i32 = arith.constant 0 : i32
    %c0_i32_0 = arith.constant 0 : i32
    %c0_i32_1 = arith.constant 0 : i32
    return %arg1, %c0_i32, %c0_i32_0 : i32, i32, i32
  }
  func.func @transform_9(%arg0: i32, %arg1: i32) -> (i32, i32, i32) {
    %c0_i32 = arith.constant 0 : i32
    %c0_i32_0 = arith.constant 0 : i32
    %c0_i32_1 = arith.constant 0 : i32
    return %arg1, %c0_i32, %c0_i32_0 : i32, i32, i32
  }
  func.func @transform_10(%arg0: i32, %arg1: i32) -> (i32, i32, i32) {
    %c0_i32 = arith.constant 0 : i32
    %c0_i32_0 = arith.constant 0 : i32
    %c0_i32_1 = arith.constant 0 : i32
    return %arg1, %c0_i32, %c0_i32_0 : i32, i32, i32
  }
  func.func @transform_11(%arg0: i32, %arg1: i32) -> (i32, i32, i32) {
    %c0_i32 = arith.constant 0 : i32
    %c0_i32_0 = arith.constant 0 : i32
    %c0_i32_1 = arith.constant 0 : i32
    return %arg1, %c0_i32, %c0_i32_0 : i32, i32, i32
  }
  func.func @transform_12(%arg0: i32, %arg1: i32) -> (i32, i32, i32) {
    %c0_i32 = arith.constant 0 : i32
    %c0_i32_0 = arith.constant 0 : i32
    %c0_i32_1 = arith.constant 0 : i32
    return %arg1, %c0_i32, %c0_i32_0 : i32, i32, i32
  }
  func.func @transform_13(%arg0: i32, %arg1: i32) -> (i32, i32, i32) {
    %c0_i32 = arith.constant 0 : i32
    %c0_i32_0 = arith.constant 0 : i32
    %c0_i32_1 = arith.constant 0 : i32
    return %arg1, %c0_i32, %c0_i32_0 : i32, i32, i32
  }
  func.func @transform_14(%arg0: i32, %arg1: i32) -> (i32, i32, i32) {
    %c0_i32 = arith.constant 0 : i32
    %c0_i32_0 = arith.constant 0 : i32
    %c0_i32_1 = arith.constant 0 : i32
    return %arg1, %c0_i32, %c0_i32_0 : i32, i32, i32
  }
  func.func @transform_15(%arg0: i32, %arg1: i32) -> (i32, i32) {
    %c0_i32 = arith.constant 0 : i32
    %c0_i32_0 = arith.constant 0 : i32
    %c0_i32_1 = arith.constant 0 : i32
    return %c0_i32, %c0_i32_0 : i32, i32
  }
  func.func @transform_16(%arg0: i32, %arg1: i32) -> (i32, i32) {
    %c0_i32 = arith.constant 0 : i32
    %c0_i32_0 = arith.constant 0 : i32
    %c0_i32_1 = arith.constant 0 : i32
    return %c0_i32, %c0_i32_0 : i32, i32
  }
  func.func @transform_17(%arg0: i32, %arg1: i32) -> (i32, i32, i32) {
    %c0_i32 = arith.constant 0 : i32
    %c0_i32_0 = arith.constant 0 : i32
    %c0_i32_1 = arith.constant 0 : i32
    return %arg0, %c0_i32, %c0_i32_0 : i32, i32, i32
  }
}

</mosaic_0001>

<bundles_post_ra>
// kernel: dinov2_forward.2
= control target key start
LH: loop header
LB: loop body
LE: loop exit
PB: predicated region body
PF: predicated region fallthrough
CT: control target
= control target key end

     0   :  { %s979_s21 = smov 0   ;;  %s1132_s0 = inlined_call_operand.vmem [shape: f32[2,4,588], index: 0, kind: input, shape index: {}]   ;;  %s1133_s1 = inlined_call_operand.vmem [shape: bf16[588,32], index: 1, kind: input, shape index: {}]   ;;  %s1134_s2 = inlined_call_operand.vmem [shape: f32[1,32], index: 2, kind: input, shape index: {}]   ;;  %s1135_s3 = inlined_call_operand.vmem [shape: f32[1,32], index: 3, kind: input, shape index: {}]   ;;  %s1136_s4 = inlined_call_operand.vmem [shape: f32[4,32], index: 4, kind: input, shape index: {}]   ;;  %s1137_s5 = inlined_call_operand.vmem [shape: f32[4,32], index: 5, kind: input, shape index: {}]   ;;  %s1138_s6 = inlined_call_operand.vmem [shape: f32[2,9,32], index: 6, kind: output, shape index: {}]  }
   0x1 LB: > { %s770_s22 = sadd.s32 4294967295, %s940_s21   ;;  %p774_p0 = scmp.ge.s32.totalorder %s940_s21, 1  ;;  %s940_s21 = sphi %s979_s21, %s16_s21  }
   0x2   : > { %p212_p1 = scmp.lt.s32.totalorder %s940_s21, 3 }
   0x4   : > { %p213_p2 = pnand %p774_p0, %p212_p1 }
   0x5   : > { %v895_v0 = vld [vmem:[%s1133_s1 + $0x40] sm:$0xff] (!%p213_p2)   ;;  %v899_v4 = vld [vmem:[%s1133_s1 + $0x48] sm:$0xff] (!%p213_p2)   ;;  %v903_v8 = vld [vmem:[%s1133_s1 + $0x50] sm:$0xff] (!%p213_p2)   ;;  %p242_p3 = scmp.lt.s32.totalorder (!%p213_p2), %s770_s22, 1  ;;  %v942_v34 = vmov (!%p213_p2), 0.0   ;;  %vm943_vm0 = vmmov (!%p213_p2), 0  }
   0x6   : > { %216 = sbr.rel (%p213_p2) target bundleno = 278 (0x116), region = 44  ;;  %v896_v1 = vld [vmem:[%s1133_s1] sm:$0xff] (!%p213_p2)   ;;  %820 = vmatprep.subr.bf16.mxu0 (!%p213_p2), %v895_v0  ;;  %v900_v5 = vld [vmem:[%s1133_s1 + $0x8] sm:$0xff] (!%p213_p2)   ;;  %v904_v9 = vld [vmem:[%s1133_s1 + $0x10] sm:$0xff] (!%p213_p2)   ;;  %vm573_vm1 = vcmask (!%p213_p2), 1045504   ;;  %vm569_vm2 = vcmask (!%p213_p2), 621568  }
   0x7   : > { %v897_v2 = vld [vmem:[%s1133_s1 + $0xc0] sm:$0xff] (!%p213_p2)   ;;  %821 = vmatpush3.bf16.msra.mxu0 (!%p213_p2), %v896_v1  ;;  %v901_v6 = vld [vmem:[%s1133_s1 + $0xc8] sm:$0xff] (!%p213_p2)   ;;  %v905_v10 = vld [vmem:[%s1133_s1 + $0xd0] sm:$0xff] (!%p213_p2)   ;;  %vm707_vm3 = vcmask (!%p213_p2), 1040384   ;;  %vm709_vm4 = vcmask (!%p213_p2), 1044480   ;;  %vm713_vm5 = vcmask (!%p213_p2), 253952  }
   0x8   : > { %v898_v3 = vld [vmem:[%s1133_s1 + $0x80] sm:$0xff] (!%p213_p2)   ;;  %842 = vmatprep.subr.bf16.mxu1 (!%p213_p2), %v897_v2  ;;  %822 = vmatprep.subr.bf16.mxu0 (!%p213_p2), %v899_v4  ;;  %v902_v7 = vld [vmem:[%s1133_s1 + $0x88] sm:$0xff] (!%p213_p2)   ;;  %v906_v11 = vld [vmem:[%s1133_s1 + $0x90] sm:$0xff] (!%p213_p2)   ;;  %vm711_vm6 = vcmask (!%p213_p2), 261120  }
   0x9   : > { %843 = vmatpush3.bf16.msra.mxu1 (!%p213_p2), %v898_v3  ;;  %v907_v12 = vld [vmem:[%s1133_s1 + $0x58] sm:$0xff] (!%p213_p2)   ;;  %v911_v16 = vld [vmem:[%s1133_s1 + $0x60] sm:$0xff] (!%p213_p2)   ;;  %v915_v20 = vld [vmem:[%s1133_s1 + $0x68] sm:$0xff] (!%p213_p2)  }
   0xa   : > { %844 = vmatprep.subr.bf16.mxu1 (!%p213_p2), %v901_v6  ;;  %v908_v13 = vld [vmem:[%s1133_s1 + $0x18] sm:$0xff] (!%p213_p2)   ;;  %v912_v17 = vld [vmem:[%s1133_s1 + $0x20] sm:$0xff] (!%p213_p2)   ;;  %v916_v21 = vld [vmem:[%s1133_s1 + $0x28] sm:$0xff] (!%p213_p2)  }
   0xb   : > { %823 = vmatpush3.bf16.msra.mxu0 (!%p213_p2), %v900_v5  ;;  %v909_v14 = vld [vmem:[%s1133_s1 + $0xd8] sm:$0xff] (!%p213_p2)   ;;  %v913_v18 = vld [vmem:[%s1133_s1 + $0xe0] sm:$0xff] (!%p213_p2)   ;;  %v917_v22 = vld [vmem:[%s1133_s1 + $0xe8] sm:$0xff] (!%p213_p2)  }
   0xc   : > { %824 = vmatprep.subr.bf16.mxu0 (!%p213_p2), %v903_v8  ;;  %v910_v15 = vld [vmem:[%s1133_s1 + $0x98] sm:$0xff] (!%p213_p2)   ;;  %v914_v19 = vld [vmem:[%s1133_s1 + $0xa0] sm:$0xff] (!%p213_p2)   ;;  %v918_v23 = vld [vmem:[%s1133_s1 + $0xa8] sm:$0xff] (!%p213_p2)  }
   0xd   : > { %845 = vmatpush3.bf16.msra.mxu1 %v902_v7  ;;  %s1140_s22 = smov (!%p242_p3, %s770_s22), 1  ;;  %v919_v24 = vld [vmem:[%s1133_s1 + $0x70] sm:$0xff]   ;;  %v923_v28 = vld [vmem:[%s1133_s1 + $0x78] sm:$0xff]   ;;  %v929_v40 = vld [vmem:[%s1133_s1 + $0x100] sm:$0xff]  }
   0xe   : > { %846 = vmatprep.subr.bf16.mxu1 %v905_v10  ;;  %s884_s29 = smul.u32 20, %s1140_s22  ;;  %v920_v25 = vld [vmem:[%s1133_s1 + $0x30] sm:$0xff]   ;;  %v924_v29 = vld [vmem:[%s1133_s1 + $0x38] sm:$0xff]   ;;  %v930_v42 = vld [vmem:[%s1133_s1 + $0x108] sm:$0xff]   ;;  %s819_s17 = sshll.u32 %s1140_s22, 4 }
   0xf   : > { %825 = vmatpush3.bf16.msra.mxu0 %v904_v9  ;;  %v921_v26 = vld [vmem:[%s1133_s1 + $0xf0] sm:$0xff]   ;;  %v925_v30 = vld [vmem:[%s1133_s1 + $0xf8] sm:$0xff]   ;;  %v933_v45 = vld [vmem:[%s1133_s1 + $0x120] sm:$0x3f]   ;;  %s251_s24 = scalar_lea.vmem %s1138_s6, %s819_s17 }
  0x10   : > { %826 = vmatprep.subr.bf16.mxu0 %v907_v12  ;;  %v922_v27 = vld [vmem:[%s1133_s1 + $0xb0] sm:$0xff]   ;;  %s1084_s16 = scalar_lea.vmem %s1132_s0, %s884_s29  ;;  %v927_v33 = vld [vmem:[%s1133_s1 + $0xb8] sm:$0xff]   ;;  %v575_v47 = vsel %vm573_vm1, %v933_v45, 0  ;;  %v778_v50 = vld [vmem:[%s1134_s2] ss:$0 sm:$0xff] }
  0x11   : > { %847 = vmatpush3.bf16.msra.mxu1 %v906_v11  ;;  %v253_v31 = vld [vmem:[%s1084_s16] sm:$0xff]  ;;  %v254_v35 = vld [vmem:[%s1084_s16 + $0x8] sm:$0xff]  ;;  %v931_v43 = vld [vmem:[%s1133_s1 + $0x110] sm:$0xff]  }
  0x12   : > { %848 = vmatprep.subr.bf16.mxu1 %v909_v14  ;;  %v258_v32 = vcombine.high %v253_v31, %v253_v31  ;;  %v262_v36 = vpack.c.bf16 %v253_v31, %v253_v31  ;;  %v259_v37 = vcombine.high %v254_v35, %v254_v35  ;;  %v264_v39 = vpack.c.bf16 %v254_v35, %v254_v35  ;;  %v932_v44 = vld [vmem:[%s1133_s1 + $0x118] sm:$0xff]   ;;  %v255_v46 = vld [vmem:[%s1084_s16 + $0x10] sm:$0xf]  ;;  %v698_v62 = vld [vmem:[%s1136_s4] sm:$0xf] }
  0x13   : > { %827 = vmatpush3.bf16.msra.mxu0 %v908_v13  ;;  %v266_v48 = vpack.c.bf16 %v255_v46, %v255_v46  ;;  %v699_v0 = vld [vmem:[%s1137_s5] sm:$0xf]  ;;  %v702_v1 = vrot.slane %v698_v62, 7 }
  0x14   : > { %828 = vmatprep.subr.bf16.mxu0 %v911_v16  ;;  %v263_v38 = vpack.c.bf16 %v258_v32, %v258_v32  ;;  %v265_v41 = vpack.c.bf16 %v259_v37, %v259_v37  ;;  %v697_v3 = vld [vmem:[%s1135_s3] sm:$0x1] }
  0x15   : > { %849 = vmatpush3.bf16.msra.mxu1 %v910_v15  ;;  %v708_v8 = vsel %vm707_vm3, %v697_v3, %v702_v1 }
  0x16   : > { %850 = vmatprep.subr.bf16.mxu1 %v913_v18  ;;  %609 = vmatprep.mubr.bf16.mxu0 %v263_v38 }
  0x17   : > { %829 = vmatpush3.bf16.msra.mxu0 %v912_v17  ;;  %649 = vmatprep.mubr.bf16.mxu1 %v265_v41 }
  0x18   : > { %830 = vmatprep.subr.bf16.mxu0 %v915_v20 }
  0x19   : > { %851 = vmatpush3.bf16.msra.mxu1 %v914_v19 }
  0x1a   : > { %852 = vmatprep.subr.bf16.mxu1 %v917_v22 }
  0x1b   : > { %831 = vmatpush3.bf16.msra.mxu0 %v916_v21 }
  0x1c   : > { %832 = vmatprep.subr.bf16.mxu0 %v919_v24 }
  0x1d   : > { %853 = vmatpush3.bf16.msra.mxu1 %v918_v23 }
  0x1e   : > { %854 = vmatprep.subr.bf16.mxu1 %v921_v26 }
  0x1f   : > { %833 = vmatpush3.bf16.msra.mxu0 %v920_v25 }
  0x20   : > { %834 = vmatprep.subr.bf16.mxu0 %v923_v28 }
  0x21   : > { %855 = vmatpush3.bf16.msra.mxu1 %v922_v27 }
  0x22   : > { %856 = vmatprep.subr.bf16.mxu1 %v925_v30 }
  0x23   : > { %835 = vmatpush3.bf16.msra.mxu0 %v924_v29 }
  0x24   : > { %870 = vmatprep.subr.bf16.mxu0 %v942_v34 }
  0x25   : > { %857 = vmatpush3.bf16.msra.mxu1 %v927_v33 }
  0x26   : > { %610 = vmatmul.mubr.bf16.vlgmr.msra.gmra.mrb[0].mxu0 %v262_v36 }
  0x27   : > { %871 = vmatpush3.bf16.msra.mxu0 %v929_v40  ;;  %880 = vmatprep.mubr.msk.bf16.mxu0 %vm943_vm0, %v942_v34 }
  0x28   : > { %650 = vmatmul.mubr.bf16.vlgmr.msra.gmra.mrb[0].mxu1 %v264_v39  ;;  %872 = vmatprep.subr.bf16.mxu0 %v942_v34 }
  0x2b   : > { %873 = vmatpush3.bf16.msra.mxu0 %v930_v42 }
  0x2c   : > { %874 = vmatprep.subr.bf16.mxu0 %v942_v34 }
  0x2f   : > { %875 = vmatpush3.bf16.msra.mxu0 %v931_v43 }
  0x30   : > { %876 = vmatprep.subr.bf16.mxu0 %v942_v34 }
  0x33   : > { %877 = vmatpush3.bf16.msra.mxu0 %v932_v44 }
  0x34   : > { %878 = vmatprep.subr.bf16.mxu0 %v942_v34 }
  0x37   : > { %879 = vmatpush3.bf16.msra.mxu0 %v575_v47 }
  0x3a   : > { %881 = vmatmul.mubr.msk.bf16.vlgmr.msra.gmra.mrb[4].mxu0 %vm569_vm2, %v266_v48 }
  0xf9   : > { %v836_v49 = vpop.f32.mrb[0].mxu0 }
  0xfa   : > { %v837_v51 = vpop.f32.mrb[1].mxu0 }
  0xfb   : > { %v858_v52 = vpop.f32.mrb[0].mxu1  ;;  %v838_v53 = vadd.f32 %v837_v51, %v836_v49  ;;  %v839_v54 = vpop.f32.mrb[2].mxu0 }
  0xfc   : > { %v859_v55 = vpop.f32.mrb[1].mxu1  ;;  %v840_v56 = vpop.f32.mrb[3].mxu0 }
  0xfd   : > { %v860_v57 = vadd.f32 %v859_v55, %v858_v52  ;;  %v861_v58 = vpop.f32.mrb[2].mxu1  ;;  %v612_v59 = vadd.f32 %v838_v53, %v778_v50 }
  0xfe   : > { %v862_v60 = vpop.f32.mrb[3].mxu1 }
  0xff   : > { %v652_v61 = vadd.f32 %v860_v57, %v612_v59 }
 0x10d   : > { %v691_v63 = vpop.f32.mrb[4].mxu0 }
 0x10e   : > { %v692_v2 = vadd.f32 %v691_v63, %v652_v61  ;;  %v882_v4 = vpop.f32.mrb[5].mxu0 }
 0x10f   : > { %v694_v5 = vpop.f32.mrb[6].mxu0 }
 0x110   : > { %v700_v6 = vadd.f32 %v699_v0, %v692_v2  ;;  %v883_v7 = vpop.f32.mrb[7].mxu0 }
 0x112   : > { %v705_v9 = vrot.slane %v700_v6, 3 }
 0x114   : > { %v710_v10 = vsel %vm709_vm4, %v708_v8, %v705_v9  ;;  %714 = vst.msk [vmem:[%s251_s24 + $0x8] sm:$0x1] %vm713_vm5, %v705_v9 }
 0x115   : > { %712 = vst.msk [vmem:[%s251_s24] sm:$0xff] %vm711_vm6, %v710_v10 }
 0x116 PF: > { %s16_s21 = sadd.s32 1, %s940_s21  }
 0x117   : > { %p13_p4 = scmp.ge.s32.totalorder %s16_s21, 4  }
 0x119   :  { %15 = sbr.rel (!%p13_p4) target bundleno = 1 (0x1), region = 74 }

// kernel: dinov2_forward.3
= control target key start
LH: loop header
LB: loop body
LE: loop exit
PB: predicated region body
PF: predicated region fallthrough
CT: control target
= control target key end

     0   :  { %s2522_s24 = smov 0   ;;  %s2524_s25 = smov 0   ;;  %s2908_s0 = inlined_call_operand.vmem [shape: f32[2,9,32], index: 0, kind: input, shape index: {}]   ;;  %s2909_s1 = inlined_call_operand.vmem [shape: f32[2,1,32], index: 1, kind: input, shape index: {}]   ;;  %s2910_s2 = inlined_call_operand.vmem [shape: f32[2,1,32], index: 2, kind: input, shape index: {}]   ;;  %s2911_s3 = inlined_call_operand.vmem [shape: bf16[2,32,96], index: 3, kind: input, shape index: {}]   ;;  %s2912_s4 = inlined_call_operand.vmem [shape: f32[2,1,96], index: 4, kind: input, shape index: {}]   ;;  %s2913_s5 = inlined_call_operand.vmem [shape: bf16[2,32,32], index: 5, kind: input, shape index: {}]   ;;  %s2914_s6 = inlined_call_operand.vmem [shape: f32[2,1,32], index: 6, kind: input, shape index: {}]   ;;  %s2915_s7 = inlined_call_operand.vmem [shape: f32[2,1,32], index: 7, kind: input, shape index: {}]   ;;  %s2916_s8 = inlined_call_operand.vmem [shape: f32[2,1,32], index: 8, kind: input, shape index: {}]   ;;  %s2917_s9 = inlined_call_operand.vmem [shape: f32[2,1,32], index: 9, kind: input, shape index: {}]   ;;  %s2918_s10 = inlined_call_operand.vmem [shape: bf16[2,32,128], index: 10, kind: input, shape index: {}]   ;;  %s2919_s11 = inlined_call_operand.vmem [shape: f32[2,1,128], index: 11, kind: input, shape index: {}]   ;;  %s2920_s12 = inlined_call_operand.vmem [shape: bf16[2,128,32], index: 12, kind: input, shape index: {}]   ;;  %s2921_s13 = inlined_call_operand.vmem [shape: f32[2,1,32], index: 13, kind: input, shape index: {}]   ;;  %s2922_s14 = inlined_call_operand.vmem [shape: f32[2,1,32], index: 14, kind: input, shape index: {}]   ;;  %s2923_s15 = inlined_call_operand.vmem [shape: f32[1,32], index: 15, kind: input, shape index: {}]   ;;  %s2924_s16 = inlined_call_operand.vmem [shape: f32[1,32], index: 16, kind: input, shape index: {}]   ;;  %s2925_s17 = inlined_call_operand.vmem [shape: f32[2,9,32], index: 17, kind: output, shape index: {}]  }
   0x1   :  { %2930 = sst [smem:[#allocation9_spill]] %s2908_s0  ;;  %s2526_s26 = smov 0  }
   0x2   :  { %2931 = sst [smem:[#allocation10_spill]] %s2909_s1  ;;  %s2528_s27 = smov 0  }
   0x3   :  { %2932 = sst [smem:[#allocation11_spill]] %s2910_s2  ;;  %s2530_s28 = smov 0  }
   0x4   :  { %2933 = sst [smem:[#allocation12_spill]] %s2911_s3 }
   0x5   :  { %2934 = sst [smem:[#allocation13_spill]] %s2913_s5 }
   0x6   :  { %2935 = sst [smem:[#allocation14_spill]] %s2917_s9 }
   0x7   :  { %2936 = sst [smem:[#allocation15_spill]] %s2918_s10 }
   0x8   :  { %2937 = sst [smem:[#allocation16_spill]] %s2922_s14 }
   0x9   :  { %2938 = sst [smem:[#allocation17_spill]] %s2923_s15 }
   0xa   :  { %2939 = sst [smem:[#allocation18_spill]] %s2924_s16 }
   0xb   :  { %2940 = sst [smem:[#allocation19_spill]] %s2925_s17 }
   0xc LB: > { %2941 = sst [smem:[#allocation3_spill]] %s2408_s24  ;;  %s36_s29 = sadd.s32 1, %s2416_s26  ;;  %s2424_s28 = sphi %s2530_s28, %s27_s28   ;;  %s2420_s27 = sphi %s2528_s27, %s2975_s27   ;;  %s2416_s26 = sphi %s2526_s26, %s2974_s26   ;;  %s2412_s25 = sphi %s2524_s25, %s2973_s25   ;;  %s2408_s24 = sphi %s2522_s24, %s2972_s24  }
   0xd   : > { %2942 = sst [smem:[#allocation4_spill]] %s2416_s26  ;;  %s39_s0 = sadd.s32 1, %s2420_s27 }
   0xe   : > { %2943 = sst [smem:[#allocation5_spill]] %s2420_s27  ;;  %p37_p0 = scmp.ge.s32.totalorder %s36_s29, 2 }
   0xf   : > { %2944 = sst [smem:[#allocation6_spill]] %s2424_s28  ;;  %p2076_p1 = scmp.ge.s32.totalorder %s2424_s28, 1 }
  0x10   : > { %p619_p2 = scmp.lt.s32.totalorder %s2424_s28, 5  ;;  %s2977_s29 = smov (%p37_p0, %s36_s29), 0 }
  0x11   : > { %2945 = sst [smem:[#allocation7_spill]] %s2977_s29  ;;  %s2979_s0 = smov (!%p37_p0, %s39_s0), %s2420_s27 }
  0x12   : > { %p620_p3 = pnand %p2076_p1, %p619_p2  ;;  %p41_p4 = scmp.ge.s32.totalorder %s2979_s0, 2 }
  0x13   : > { %p721_p5 = scmp.lt.s32.totalorder (!%p620_p3), %s2412_s25, 1  ;;  %p726_p6 = scmp.lt.s32.totalorder (!%p620_p3), %s2408_s24, 1 }
  0x14   : > { %s2981_s0 = smov (%p41_p4, %s2979_s0), 0  ;;  %623 = sbr.rel (%p620_p3) target bundleno = 2467 (0x9a3), region = 88 }
  0x15   : > { %2946 = sst [smem:[#allocation8_spill]] %s2981_s0  ;;  %s2947_s20 = sld [smem:[#allocation9_spill]] (!%p620_p3) }
  0x16   : > { %s2950_s3 = sld [smem:[#allocation12_spill]] (!%p620_p3)  ;;  %s2951_s5 = sld [smem:[#allocation13_spill]] (!%p620_p3) }
  0x17   : > { %s2953_s10 = sld [smem:[#allocation15_spill]] (!%p620_p3) }
  0x1b   : > { %s2983_s25 = smov (!%p721_p5, %s2412_s25), 1 }
  0x1c   : > { %s2556_s30 = scalar_select %p726_p6, %s2408_s24, 1 }
  0x1d   : > { %s2134_s18 = sshll.u32 %s2983_s25, 4 }
  0x1e   : > { %s725_s21 = scalar_lea.vmem %s2947_s20, %s2134_s18  ;;  %s2135_s16 = sshll.u32 %s2556_s30, 4 }
  0x1f   : > { %s2573_s17 = scalar_lea.vmem %s2950_s3, %s2135_s16  ;;  %s2582_s22 = scalar_lea.vmem %s2951_s5, %s2135_s16 }
  0x20   : > { %s2603_s20 = scalar_lea.vmem %s2953_s10, %s2135_s16  ;;  %s764_s23 = scalar_lea.vmem %s2919_s11, %s2556_s30 }
  0x21   : > { %s2138_s26 = sshll.u32 %s2556_s30, 6  ;;  %s772_s2 = scalar_lea.vmem %s2921_s13, %s2556_s30 }
  0x22   : > { %s2613_s29 = scalar_lea.vmem %s2920_s12, %s2138_s26  ;;  %s2954_s3 = sld [smem:[#allocation16_spill]] }
  0x23   : > { %s2955_s10 = sld [smem:[#allocation19_spill]]  ;;  %s2956_s5 = sld [smem:[#allocation3_spill]] }
  0x28   : > { %s775_s19 = scalar_lea.vmem %s2954_s3, %s2556_s30 }
  0x29   : > { %s2626_s9 = scalar_lea.vmem %s2955_s10, %s2134_s18  ;;  %p2089_p7 = scmp.ne.s32.totalorder %s2956_s5, 0 }
  0x2a   : > { %v786_v0 = vld [vmem:[%s725_s21] sm:$0xff] (!%p2089_p7)  ;;  %vm788_vm0 = vcmask (!%p2089_p7), 261120   ;;  %v787_v1 = vld [vmem:[%s725_s21 + $0x8] sm:$0x1] (!%p2089_p7)  ;;  %vm790_vm1 = vcmask (!%p2089_p7), 253952  }
  0x2b   : > { %785 = sbr.rel (%p2089_p7) target bundleno = 50 (0x32), region = 92  ;;  %789 = vst.msk [vmem:[#allocation2] sm:$0xff] (!%p2089_p7), %vm788_vm0, %v786_v0 }
  0x2c   : > { %791 = vst.msk [vmem:[#allocation2 + $0x8] sm:$0x1] (!%p2089_p7), %vm790_vm1, %v787_v1 }
  0x32 PF: > { %v2629_v2 = vld [vmem:[#allocation2] sm:$0xff]  ;;  %vm796_vm2 = vcmask 261120   ;;  %vm800_vm3 = vcmask 253952   ;;  %v2426_v11 = vmov 0.0   ;;  %vm2427_vm4 = vmmov 0   ;;  %v2325_v12 = vld [vmem:[%s2573_s17 + $0x8] sm:$0xff]   ;;  %s2961_s24 = scalar_lea.vmem %s2912_s4, %s2556_s30 }
  0x33   : > { %v2631_v3 = vld [vmem:[#allocation2 + $0x8] sm:$0x1]  ;;  %v797_v4 = vsel %vm796_vm2, %v2629_v2, 0.0  ;;  %v807_v5 = vmul.f32 %v2629_v2, %v2629_v2  ;;  %v2324_v10 = vld [vmem:[%s2573_s17] sm:$0xff]   ;;  %2174 = vmatprep.subr.bf16.mxu0 %v2426_v11  ;;  %2178 = vmatprep.mubr.msk.bf16.mxu0 %vm2427_vm4, %v2426_v11  ;;  %v916_v13 = vlaneseq  ;;  %s2428_s3 = smov 32   ;;  %s2957_s18 = sld [smem:[#allocation10_spill]] }
  0x34   : > { %v801_v6 = vsel %vm800_vm3, %v2631_v3, 0.0  ;;  %v808_v7 = vmul.f32 %v2631_v3, %v2631_v3  ;;  %798 = vadd.xlane.f32.xlu0 %v797_v4  ;;  %2175 = vmatpush3.bf16.msra.mxu0 %v2324_v10  ;;  %s2959_s0 = sld [smem:[#allocation11_spill]]  ;;  %v2092_v53 = vld [vmem:[%s2961_s24] ss:$0 sm:$0xff]  ;;  %s2429_s14 = smov 96   ;;  %vm1001_vm15 = vcmask 72704  }
  0x35   : > { %v809_v8 = vsel %vm796_vm2, %v807_v5, 0.0  ;;  %2194 = vmatprep.subr.bf16.mxu1 %v2426_v11  ;;  %2176 = vmatprep.subr.bf16.mxu0 %v2426_v11  ;;  %v917_v14 = vand.u32 127, %v916_v13  ;;  %vm1005_vm0 = vcmask 65536   ;;  %s2430_s16 = smov 64   ;;  %vm1111_vm1 = vcmask 1043456   ;;  %s2963_s17 = scalar_lea.vmem %s2915_s7, %s2556_s30 }
  0x36   : > { %v812_v9 = vsel %vm800_vm3, %v808_v7, 0.0  ;;  %810 = vadd.xlane.f32.xlu1 %v809_v8  ;;  %2196 = vmatprep.mubr.msk.bf16.mxu1 %vm2427_vm4, %v2426_v11 }
  0x37   : > { %vm924_vm5 = vcmp.ge.s32.totalorder %v917_v14, 8  ;;  %vm925_vm6 = vcmp.lt.s32.totalorder %v917_v14, 16  ;;  %vm930_vm7 = vcmp.ge.s32.totalorder %v917_v14, 16  ;;  %vm931_vm8 = vcmp.lt.s32.totalorder %v917_v14, 24 }
  0x38   : > { %802 = vadd.xlane.f32.xlu0 %v801_v6  ;;  %2177 = vmatpush3.bf16.msra.mxu0 %v2325_v12  ;;  %vm926_vm9 = vmand %vm924_vm5, %vm925_vm6  ;;  %vm936_vm10 = vcmp.ge.s32.totalorder %v917_v14, 24  ;;  %vm937_vm11 = vcmp.lt.s32.totalorder %v917_v14, 32  ;;  %vm919_vm12 = vcmp.lt.s32.totalorder %v917_v14, 8  ;;  %vm1112_vm5 = vcmask 1044480  }
  0x39   : > { %2182 = vmatprep.subr.bf16.mxu0 %v2426_v11  ;;  %v2097_v15 = vsel %vm926_vm9, 1.0, %v2426_v11  ;;  %vm932_vm13 = vmand %vm930_vm7, %vm931_vm8  ;;  %v2096_v16 = vsel %vm919_vm12, 1.0, %v2426_v11  ;;  %s2958_s21 = scalar_lea.vmem %s2957_s18, %s2556_s30 }
  0x3a   : > { %813 = vadd.xlane.f32.xlu1 %v812_v9  ;;  %v2655_v17 = vpack.c.bf16 %v2097_v15, %v2097_v15  ;;  %v2098_v18 = vsel %vm932_vm13, 1.0, %v2426_v11  ;;  %vm938_vm14 = vmand %vm936_vm10, %vm937_vm11  ;;  %v2658_v19 = vpack.c.bf16 %v2096_v16, %v2096_v16  ;;  %v2090_v42 = vld [vmem:[%s2958_s21] ss:$0 sm:$0xff]  ;;  %s2960_s28 = scalar_lea.vmem %s2959_s0, %s2556_s30  ;;  %s2964_s21 = scalar_lea.vmem %s2916_s8, %s2556_s30 }
  0x3b   : > { %v2661_v20 = vpack.c.bf16 %v2098_v18, %v2098_v18  ;;  %v2099_v21 = vsel %vm938_vm14, 1.0, %v2426_v11  ;;  %v2091_v47 = vld [vmem:[%s2960_s28] ss:$0 sm:$0xff]  ;;  %s2965_s0 = sld [smem:[#allocation14_spill]] }
  0x3c   : > { %v2666_v22 = vpack.c.bf16 %v2099_v21, %v2099_v21 }
  0x41   : > { %s2966_s28 = scalar_lea.vmem %s2965_s0, %s2556_s30 }
  0x4b   : > { %1027 = vrot.lane.b32.xlu1 %v2655_v17, %s2428_s3 }
  0x4e   : > { %943 = vrot.lane.b32.xlu0 %v2658_v19, %s2428_s3 }
  0x4f   : > { %1210 = vrot.lane.b32.xlu1 %v2661_v20, %s2428_s3 }
  0x53   : > { %1341 = vrot.lane.b32.xlu1 %v2666_v22, %s2428_s3  ;;  %s2962_s3 = scalar_lea.vmem %s2914_s6, %s2556_s30 }
  0xc1   : > { %v799_v23 = vpop.xlane.xlu0 %798 }
  0xc2   : > { %v805_v24 = vmul.f32 0.03125, %v799_v23 }
  0xc3   : > { %v811_v25 = vpop.xlane.xlu1 %810 }
  0xc4   : > { %v817_v26 = vmul.f32 %v805_v24, %v805_v24  ;;  %v815_v27 = vmul.f32 0.03125, %v811_v25  ;;  %v823_v39 = vsub.f32 %v2629_v2, %v805_v24 }
  0xc5   : > { %v803_v28 = vpop.xlane.xlu0 %802 }
  0xc6   : > { %v819_v29 = vsub.f32 %v815_v27, %v817_v26  ;;  %v806_v30 = vmul.f32 0.03125, %v803_v28 }
  0xc7   : > { %v814_v31 = vpop.xlane.xlu1 %813 }
  0xc8   : > { %v821_v32 = vmax.f32 %v819_v29, 0.0  ;;  %v818_v33 = vmul.f32 %v806_v30, %v806_v30  ;;  %v816_v34 = vmul.f32 0.03125, %v814_v31  ;;  %v824_v43 = vsub.f32 %v2631_v3, %v806_v30 }
  0xc9   : > { %v944_v61 = vpop.permute.xlu0 %943 }
  0xca   : > { %v825_v35 = vadd.f32 1e-06, %v821_v32  ;;  %v820_v36 = vsub.f32 %v816_v34, %v818_v33 }
  0xcb   : > { %v1028_v52 = vpop.permute.xlu1 %1027 }
  0xcc   : > { %2338 = vrsqrt.f32 %v825_v35  ;;  %v822_v37 = vmax.f32 %v820_v36, 0.0 }
  0xce   : > { %v826_v38 = vadd.f32 1e-06, %v822_v37 }
  0xcf   : > { %v1211_v56 = vpop.permute.xlu1 %1210 }
  0xd0   : > { %2340 = vrsqrt.f32 %v826_v38 }
  0xd3   : > { %v1342_v1 = vpop.permute.xlu1 %1341 }
  0xd6   : > { %v2339_v40 = vpop.eup %2338 }
  0xd7   : > { %v829_v41 = vmul.f32 %v2339_v40, %v823_v39 }
  0xd9   : > { %v837_v46 = vmul.f32 %v2090_v42, %v829_v41 }
  0xda   : > { %v2341_v44 = vpop.eup %2340 }
  0xdb   : > { %v830_v45 = vmul.f32 %v2341_v44, %v824_v43  ;;  %v845_v49 = vadd.f32 %v2091_v47, %v837_v46 }
  0xdd   : > { %v838_v48 = vmul.f32 %v2090_v42, %v830_v45 }
  0xdf   : > { %v846_v50 = vadd.f32 %v2091_v47, %v838_v48 }
  0xe1   : > { %v847_v51 = vpack.c.bf16 %v846_v50, %v845_v49 }
  0xe3   : > { %2179 = vmatmul.mubr.msk.bf16.vlgmr.msra.gmra.mrb[0].mxu0 %vm796_vm2, %v847_v51 }
  0xe4   : > { %2184 = vmatprep.mubr.msk.bf16.mxu0 %vm2427_vm4, %v2426_v11 }
 0x1b6   : > { %v908_v54 = vpop.f32.mrb[0].mxu0 }
 0x1b7   : > { %v2180_v55 = vpop.f32.mrb[1].mxu0  ;;  %v909_v58 = vadd.f32 %v2092_v53, %v908_v54 }
 0x1b8   : > { %v911_v57 = vpop.f32.mrb[2].mxu0 }
 0x1b9   : > { %v912_v59 = vadd.f32 %v2092_v53, %v911_v57  ;;  %v2181_v60 = vpop.f32.mrb[3].mxu0 }
 0x1bb   : > { %v2689_v62 = vpack.c.bf16 %v912_v59, %v909_v58 }
 0x1bd   : > { %v946_v63 = vmul.bf16 %v944_v61, %v2689_v62  ;;  %v1030_v0 = vmul.bf16 %v1028_v52, %v2689_v62  ;;  %v1344_v4 = vmul.bf16 %v1342_v1, %v2689_v62  ;;  %v1213_v5 = vmul.bf16 %v1211_v56, %v2689_v62 }
 0x1bf   : > { %1036 = vrot.lane.b32.xlu1 %v1030_v0, %s2429_s14  ;;  %952 = vrot.lane.b32.xlu0 %v946_v63, %s2429_s14 }
 0x1c3   : > { %1350 = vrot.lane.b32.xlu1 %v1344_v4, %s2429_s14  ;;  %1219 = vrot.lane.b32.xlu0 %v1213_v5, %s2429_s14 }
 0x231   : > { %v953_v6 = vpop.permute.xlu0 %952  ;;  %v1037_v8 = vpop.permute.xlu1 %1036 }
 0x232   : > { %v958_v7 = vsel %vm796_vm2, %v953_v6, 0  ;;  %v1039_v9 = vsel %vm796_vm2, %v1037_v8, 0 }
 0x233   : > { %2183 = vmatpush3.bf16.xpose.msra.mxu0 %v958_v7 }
 0x234   : > { %2188 = vmatprep.subr.bf16.mxu0 %v2426_v11 }
 0x235   : > { %v1220_v10 = vpop.permute.xlu0 %1219  ;;  %v1351_v13 = vpop.permute.xlu1 %1350 }
 0x236   : > { %v1222_v12 = vsel %vm796_vm2, %v1220_v10, 0  ;;  %v1353_v14 = vsel %vm796_vm2, %v1351_v13, 0 }
 0x23a   : > { %2185 = vmatmul.mubr.msk.bf16.vlgmr.msra.gmra.mrb[4].mxu0 %vm796_vm2, %v2689_v62 }
 0x23b   : > { %2189 = vmatpush3.bf16.xpose.msra.mxu0 %v1039_v9  ;;  %2190 = vmatprep.mubr.msk.bf16.mxu0 %vm2427_vm4, %v2426_v11 }
 0x23c   : > { %2206 = vmatprep.subr.bf16.mxu0 %v2426_v11 }
 0x242   : > { %2191 = vmatmul.mubr.msk.bf16.vlgmr.msra.gmra.mrb[8].mxu0 %vm796_vm2, %v2689_v62 }
 0x243   : > { %2207 = vmatpush3.bf16.xpose.msra.mxu0 %v1222_v12  ;;  %2208 = vmatprep.mubr.msk.bf16.mxu0 %vm2427_vm4, %v2426_v11 }
 0x244   : > { %2218 = vmatprep.subr.bf16.mxu0 %v2426_v11 }
 0x24a   : > { %2209 = vmatmul.mubr.msk.bf16.vlgmr.msra.gmra.mrb[12].mxu0 %vm796_vm2, %v2689_v62 }
 0x24b   : > { %2219 = vmatpush3.bf16.xpose.msra.mxu0 %v1353_v14  ;;  %2220 = vmatprep.mubr.msk.bf16.mxu0 %vm2427_vm4, %v2426_v11 }
 0x24c   : > { %2230 = vmatprep.subr.bf16.mxu0 %v2426_v11 }
 0x252   : > { %2221 = vmatmul.mubr.msk.bf16.vlgmr.msra.gmra.mrb[16].mxu0 %vm796_vm2, %v2689_v62 }
 0x253   : > { %2234 = vmatprep.mubr.msk.bf16.mxu0 %vm2427_vm4, %v2426_v11 }
 0x30d   : > { %v994_v15 = vpop.f32.mrb[4].mxu0 }
 0x30e   : > { %v2186_v16 = vpop.f32.mrb[5].mxu0  ;;  %v1002_v18 = vsel %vm1001_vm15, %v994_v15, -inf }
 0x30f   : > { %1003 = vmax.xlane.f32.xlu0 %v1002_v18  ;;  %v997_v21 = vpop.f32.mrb[6].mxu0 }
 0x310   : > { %v2187_v23 = vpop.f32.mrb[7].mxu0  ;;  %v1006_v24 = vsel %vm1005_vm0, %v997_v21, -inf }
 0x313   : > { %1007 = vmax.xlane.f32.xlu0 %v1006_v24 }
 0x315   : > { %v1075_v25 = vpop.f32.mrb[8].mxu0 }
 0x316   : > { %v2192_v26 = vpop.f32.mrb[9].mxu0  ;;  %v1082_v27 = vsel %vm1001_vm15, %v1075_v25, -inf }
 0x317   : > { %1083 = vmax.xlane.f32.xlu0 %v1082_v27  ;;  %v1078_v28 = vpop.f32.mrb[10].mxu0 }
 0x318   : > { %v2193_v29 = vpop.f32.mrb[11].mxu0  ;;  %v1085_v30 = vsel %vm1005_vm0, %v1078_v28, -inf }
 0x319   : > { %1086 = vmax.xlane.f32.xlu1 %v1085_v30  ;;  %v2326_v30 = vld [vmem:[%s2582_s22] sm:$0xff]  }
 0x31a   : > { %2231 = vmatpush3.bf16.msra.mxu0 %v2326_v30 }
 0x31b   : > { %2232 = vmatprep.subr.bf16.mxu0 %v2426_v11 }
 0x31d   : > { %v1258_v31 = vpop.f32.mrb[12].mxu0 }
 0x31e   : > { %v2210_v32 = vpop.f32.mrb[13].mxu0  ;;  %v1265_v33 = vsel %vm1001_vm15, %v1258_v31, -inf }
 0x31f   : > { %1266 = vmax.xlane.f32.xlu0 %v1265_v33  ;;  %v1261_v34 = vpop.f32.mrb[14].mxu0 }
 0x320   : > { %v2211_v35 = vpop.f32.mrb[15].mxu0  ;;  %v1268_v40 = vsel %vm1005_vm0, %v1261_v34, -inf }
 0x321   : > { %v2431_v35 = vmov 65535  }
 0x325   : > { %v1389_v36 = vpop.f32.mrb[16].mxu0 }
 0x326   : > { %v2222_v37 = vpop.f32.mrb[17].mxu0  ;;  %v1396_v41 = vsel %vm1001_vm15, %v1389_v36, -inf }
 0x327   : > { %v1392_v38 = vpop.f32.mrb[18].mxu0 }
 0x328   : > { %v2223_v39 = vpop.f32.mrb[19].mxu0  ;;  %v1399_v42 = vsel %vm1005_vm0, %v1392_v38, -inf }
 0x32a   : > { %947 = vrot.lane.b32.xlu1 %v2658_v19, %s2430_s16 }
 0x32e   : > { %1214 = vrot.lane.b32.xlu1 %v2661_v20, %s2430_s16 }
 0x335   : > { %1031 = vrot.lane.b32.xlu0 %v2655_v17, %s2430_s16 }
 0x352   : > { %1269 = vmax.xlane.f32.xlu1 %v1268_v40 }
 0x354   : > { %1397 = vmax.xlane.f32.xlu0 %v1396_v41 }
 0x356   : > { %1400 = vmax.xlane.f32.xlu1 %v1399_v42 }
 0x39c   : > { %v1004_v43 = vpop.xlane.xlu0 %1003 }
 0x39d   : > { %v1009_v45 = vsub.f32 %v994_v15, %v1004_v43 }
 0x39f   : > { %v1011_v47 = vmul.f32 1.442695, %v1009_v45 }
 0x3a0   : > { %v1008_v44 = vpop.xlane.xlu0 %1007 }
 0x3a1   : > { %v1010_v20 = vsub.f32 %v997_v21, %v1008_v44 }
 0x3a3   : > { %v1013_v51 = vmul.f32 1.442695, %v1010_v20 }
 0x3a4   : > { %v1084_v46 = vpop.xlane.xlu0 %1083 }
 0x3a5   : > { %v1088_v19 = vsub.f32 %v1075_v25, %v1084_v46 }
 0x3a6   : > { %v1087_v48 = vpop.xlane.xlu1 %1086 }
 0x3a7   : > { %v1090_v49 = vmul.f32 1.442695, %v1088_v19  ;;  %v1089_v50 = vsub.f32 %v1078_v28, %v1087_v48 }
 0x3a9   : > { %2342 = vpow2.f32 %v1090_v49  ;;  %v1092_v17 = vmul.f32 1.442695, %v1089_v50 }
 0x3aa   : > { %2344 = vpow2.f32 %v1011_v47  ;;  %v948_v0 = vpop.permute.xlu1 %947 }
 0x3ab   : > { %2346 = vpow2.f32 %v1092_v17  ;;  %v950_v27 = vmul.bf16 %v948_v0, %v2689_v62 }
 0x3ac   : > { %2348 = vpow2.f32 %v1013_v51  ;;  %v1267_v60 = vpop.xlane.xlu0 %1266 }
 0x3ad   : > { %v1271_v1 = vsub.f32 %v1258_v31, %v1267_v60 }
 0x3ae   : > { %v1215_v5 = vpop.permute.xlu1 %1214 }
 0x3af   : > { %v1273_v4 = vmul.f32 1.442695, %v1271_v1  ;;  %v1217_v28 = vmul.bf16 %v1215_v5, %v2689_v62 }
 0x3b0   : > { %v1032_v61 = vpop.permute.xlu0 %1031 }
 0x3b1   : > { %v1034_v63 = vmul.bf16 %v1032_v61, %v2689_v62  ;;  %2350 = vpow2.f32 %v1273_v4 }
 0x3b3   : > { %v2733_v52 = vpop.eup %2342 }
 0x3b4   : > { %v2735_v53 = vpop.eup %2344  ;;  %v1094_v54 = vsel %vm1001_vm15, %v2733_v52, 0.0 }
 0x3b5   : > { %v2739_v55 = vpop.eup %2346  ;;  %1095 = vadd.xlane.f32.xlu1 %v1094_v54  ;;  %v1015_v57 = vsel %vm1001_vm15, %v2735_v53, 0.0 }
 0x3b6   : > { %v1097_v56 = vsel %vm1005_vm0, %v2739_v55, 0.0  ;;  %v2745_v58 = vpop.eup %2348 }
 0x3b7   : > { %1098 = vadd.xlane.f32.xlu0 %v1097_v56  ;;  %v1018_v59 = vsel %vm1005_vm0, %v2745_v58, 0.0 }
 0x3b9   : > { %1016 = vadd.xlane.f32.xlu1 %v1015_v57 }
 0x3bb   : > { %v2753_v15 = vpop.eup %2350 }
 0x3bc   : > { %v1277_v16 = vsel %vm1001_vm15, %v2753_v15, 0.0 }
 0x3bd   : > { %1019 = vadd.xlane.f32.xlu1 %v1018_v59 }
 0x3cd   : > { %1345 = vrot.lane.b32.xlu0 %v2666_v22, %s2430_s16 }
 0x3ce   : > { %1106 = vrot.lane.b32.xlu1 %v1034_v63, %s2430_s16 }
 0x3df   : > { %v1270_v6 = vpop.xlane.xlu1 %1269 }
 0x3e0   : > { %v1272_v7 = vsub.f32 %v1261_v34, %v1270_v6  ;;  %v2327_v6 = vld [vmem:[%s2582_s22 + $0x8] sm:$0xff]  }
 0x3e1   : > { %v1398_v8 = vpop.xlane.xlu0 %1397  ;;  %2233 = vmatpush3.bf16.msra.mxu0 %v2327_v6  ;;  %v2115_v6 = vld [vmem:[%s764_s23] ss:$0 sm:$0xff] }
 0x3e2   : > { %v1275_v9 = vmul.f32 1.442695, %v1272_v7  ;;  %v1402_v10 = vsub.f32 %v1389_v36, %v1398_v8  ;;  %v1113_v36 = vsel %vm1111_vm1, 4294967295, %v2431_v35  ;;  %2238 = vmatprep.subr.bf16.mxu0 %v2426_v11 }
 0x3e3   : > { %v1401_v12 = vpop.xlane.xlu1 %1400 }
 0x3e4   : > { %2352 = vpow2.f32 %v1275_v9  ;;  %v1404_v13 = vmul.f32 1.442695, %v1402_v10  ;;  %v1403_v14 = vsub.f32 %v1392_v38, %v1401_v12  ;;  %v1114_v38 = vsel %vm1112_vm5, %v1113_v36, 0 }
 0x3e6   : > { %2354 = vpow2.f32 %v1404_v13  ;;  %v1406_v22 = vmul.f32 1.442695, %v1403_v14  ;;  %v2108_v13 = vld [vmem:[%s2962_s3] ss:$0 sm:$0xff] }
 0x3e8   : > { %2356 = vpow2.f32 %v1406_v22 }
 0x3ec   : > { %1278 = vadd.xlane.f32.xlu0 %v1277_v16 }
 0x3ee   : > { %v2353_v18 = vpop.eup %2352 }
 0x3ef   : > { %v1280_v21 = vsel %vm1005_vm0, %v2353_v18, 0.0 }
 0x3f0   : > { %v2758_v23 = vpop.eup %2354 }
 0x3f1   : > { %v1408_v24 = vsel %vm1001_vm15, %v2758_v23, 0.0 }
 0x3f2   : > { %1281 = vadd.xlane.f32.xlu1 %v1280_v21  ;;  %v2762_v25 = vpop.eup %2356 }
 0x3f3   : > { %v1411_v26 = vsel %vm1005_vm0, %v2762_v25, 0.0 }
 0x3f6   : > { %1409 = vadd.xlane.f32.xlu1 %v1408_v24 }
 0x3fa   : > { %1412 = vadd.xlane.f32.xlu1 %v1411_v26 }
 0x402   : > { %1160 = vrot.lane.b32.xlu0 %v950_v27, %s2430_s16 }
 0x40b   : > { %1289 = vrot.lane.b32.xlu1 %v1217_v28, %s2430_s16 }
 0x442   : > { %v1096_v29 = vpop.xlane.xlu1 %1095 }
 0x443   : > { %2358 = vrcp.f32 %v1096_v29 }
 0x444   : > { %v1099_v31 = vpop.xlane.xlu0 %1098 }
 0x445   : > { %2360 = vrcp.f32 %v1099_v31 }
 0x446   : > { %v1017_v32 = vpop.xlane.xlu1 %1016 }
 0x448   : > { %v1346_v33 = vpop.permute.xlu0 %1345 }
 0x449   : > { %v1348_v34 = vmul.bf16 %v1346_v33, %v2689_v62  ;;  %v2329_v33 = vld [vmem:[%s2603_s20 + $0x8] sm:$0xff]  }
 0x44a   : > { %v1020_v37 = vpop.xlane.xlu1 %1019 }
 0x44b   : > { %1420 = vrot.lane.b32.xlu0 %v1348_v34, %s2430_s16  ;;  %2362 = vrcp.f32 %v1020_v37 }
 0x44c   : > { %2364 = vrcp.f32 %v1017_v32  ;;  %v2328_v32 = vld [vmem:[%s2603_s20] sm:$0xff]  }
 0x44d   : > { %v2359_v39 = vpop.eup %2358 }
 0x44e   : > { %v1107_v40 = vpop.permute.xlu1 %1106  ;;  %v1102_v43 = vmul.f32 %v2359_v39, %v2733_v52 }
 0x44f   : > { %v2361_v41 = vpop.eup %2360  ;;  %v1116_v42 = vand.u32 %v1114_v38, %v1107_v40 }
 0x450   : > { %v1103_v44 = vmul.f32 %v2361_v41, %v2739_v55 }
 0x451   : > { %2195 = vmatpush3.bf16.msra.mxu1 %v1116_v42 }
 0x452   : > { %v1104_v45 = vpack.c.bf16 %v1103_v44, %v1102_v43  ;;  %2200 = vmatprep.subr.bf16.mxu1 %v2426_v11 }
 0x454   : > { %2197 = vmatmul.mubr.msk.bf16.vlgmr.msra.gmra.mrb[0].mxu1 %vm1001_vm15, %v1104_v45 }
 0x455   : > { %2202 = vmatprep.mubr.msk.bf16.mxu1 %vm2427_vm4, %v2426_v11  ;;  %v2363_v46 = vpop.eup %2362 }
 0x456   : > { %v2365_v19 = vpop.eup %2364  ;;  %v1024_v47 = vmul.f32 %v2363_v46, %v2745_v58 }
 0x457   : > { %v1023_v49 = vmul.f32 %v2365_v19, %v2735_v53 }
 0x459   : > { %v1025_v17 = vpack.c.bf16 %v1024_v47, %v1023_v49 }
 0x479   : > { %v1279_v62 = vpop.xlane.xlu0 %1278 }
 0x47a   : > { %2366 = vrcp.f32 %v1279_v62 }
 0x47d   : > { %v1161_v48 = vpop.permute.xlu0 %1160 }
 0x47e   : > { %v1166_v20 = vand.u32 %v1161_v48, %v1114_v38 }
 0x47f   : > { %v1282_v50 = vpop.xlane.xlu1 %1281 }
 0x480   : > { %2368 = vrcp.f32 %v1282_v50  ;;  %2201 = vmatpush3.bf16.msra.mxu1 %v1166_v20  ;;  %v2113_v50 = vld [vmem:[%s2964_s21] ss:$0 sm:$0xff] }
 0x481   : > { %2212 = vmatprep.subr.bf16.mxu1 %v2426_v11 }
 0x483   : > { %v1410_v51 = vpop.xlane.xlu1 %1409  ;;  %2203 = vmatmul.mubr.msk.bf16.vlgmr.msra.gmra.mrb[0].mxu1 %vm1001_vm15, %v1025_v17 }
 0x484   : > { %2214 = vmatprep.mubr.msk.bf16.mxu1 %vm2427_vm4, %v2426_v11  ;;  %v2367_v54 = vpop.eup %2366 }
 0x485   : > { %v1285_v53 = vmul.f32 %v2367_v54, %v2753_v15  ;;  %v2112_v15 = vld [vmem:[%s2963_s17] ss:$0 sm:$0xff] }
 0x487   : > { %v1413_v52 = vpop.xlane.xlu1 %1412 }
 0x488   : > { %2370 = vrcp.f32 %v1413_v52 }
 0x489   : > { %2372 = vrcp.f32 %v1410_v51 }
 0x48a   : > { %v2369_v55 = vpop.eup %2368 }
 0x48b   : > { %v1286_v56 = vmul.f32 %v2369_v55, %v2353_v18  ;;  %v1290_v57 = vpop.permute.xlu1 %1289  ;;  %v2114_v55 = vld [vmem:[%s2966_s28] ss:$0 sm:$0xff] }
 0x48c   : > { %v1295_v58 = vand.u32 %v1290_v57, %v1114_v38 }
 0x48d   : > { %v1287_v59 = vpack.c.bf16 %v1286_v56, %v1285_v53 }
 0x48e   : > { %2213 = vmatpush3.bf16.msra.mxu1 %v1295_v58 }
 0x48f   : > { %2224 = vmatprep.subr.bf16.mxu1 %v2426_v11 }
 0x491   : > { %2215 = vmatmul.mubr.msk.bf16.vlgmr.msra.gmra.mrb[0].mxu1 %vm1001_vm15, %v1287_v59  ;;  %v2330_v59 = vld [vmem:[%s2613_s29] sm:$0xff]  }
 0x492   : > { %2226 = vmatprep.mubr.msk.bf16.mxu1 %vm2427_vm4, %v2426_v11  ;;  %v2371_v60 = vpop.eup %2370 }
 0x493   : > { %v2373_v61 = vpop.eup %2372  ;;  %v1417_v63 = vmul.f32 %v2371_v60, %v2762_v25  ;;  %v2331_v60 = vld [vmem:[%s2613_s29 + $0x8] sm:$0xff]  }
 0x494   : > { %v1416_v4 = vmul.f32 %v2373_v61, %v2758_v23  ;;  %v2332_v61 = vld [vmem:[%s2613_s29 + $0x10] sm:$0xff]  }
 0x496   : > { %v1418_v5 = vpack.c.bf16 %v1417_v63, %v1416_v4  ;;  %v2333_v63 = vld [vmem:[%s2613_s29 + $0x18] sm:$0xff]   ;;  %v2336_v4 = vld [vmem:[%s2613_s29 + $0x30] sm:$0xff]  }
 0x4bd   : > { %v1421_v0 = vpop.permute.xlu0 %1420 }
 0x4be   : > { %v1426_v1 = vand.u32 %v1421_v0, %v1114_v38  ;;  %v2334_v0 = vld [vmem:[%s2613_s29 + $0x20] sm:$0xff]  }
 0x4c0   : > { %2225 = vmatpush3.bf16.msra.mxu1 %v1426_v1  ;;  %v2335_v1 = vld [vmem:[%s2613_s29 + $0x28] sm:$0xff]  }
 0x4c1   : > { %2246 = vmatprep.subr.bf16.mxu1 %v2426_v11 }
 0x4c3   : > { %2227 = vmatmul.mubr.msk.bf16.vlgmr.msra.gmra.mrb[0].mxu1 %vm1001_vm15, %v1418_v5  ;;  %v2337_v5 = vld [vmem:[%s2613_s29 + $0x38] sm:$0xff]  }
 0x4c4   : > { %2262 = vmatprep.mubr.msk.bf16.mxu1 %vm2427_vm4, %v2426_v11  ;;  %2247 = vmatpush3.bf16.msra.mxu1 %v2330_v59 }
 0x4c5   : > { %2248 = vmatprep.subr.bf16.mxu1 %v2426_v11 }
 0x4c8   : > { %2249 = vmatpush3.bf16.msra.mxu1 %v2331_v60 }
 0x4c9   : > { %2250 = vmatprep.subr.bf16.mxu1 %v2426_v11 }
 0x4cc   : > { %2251 = vmatpush3.bf16.msra.mxu1 %v2332_v61 }
 0x4cd   : > { %2252 = vmatprep.subr.bf16.mxu1 %v2426_v11 }
 0x4d0   : > { %2253 = vmatpush3.bf16.msra.mxu1 %v2333_v63 }
 0x4d1   : > { %2254 = vmatprep.subr.bf16.mxu1 %v2426_v11 }
 0x4d4   : > { %2255 = vmatpush3.bf16.msra.mxu1 %v2334_v0 }
 0x4d5   : > { %2256 = vmatprep.subr.bf16.mxu1 %v2426_v11 }
 0x4d8   : > { %2257 = vmatpush3.bf16.msra.mxu1 %v2335_v1 }
 0x4d9   : > { %2258 = vmatprep.subr.bf16.mxu1 %v2426_v11 }
 0x4dc   : > { %2259 = vmatpush3.bf16.msra.mxu1 %v2336_v4 }
 0x4dd   : > { %2260 = vmatprep.subr.bf16.mxu1 %v2426_v11 }
 0x4e0   : > { %2261 = vmatpush3.bf16.msra.mxu1 %v2337_v5 }
 0x596   : > { %v1462_v7 = vpop.f32.mrb[0].mxu1 }
 0x597   : > { %v2228_v8 = vpop.f32.mrb[1].mxu1 }
 0x598   : > { %v1465_v9 = vpop.f32.mrb[2].mxu1 }
 0x599   : > { %v1471_v10 = vpack.c.bf16 %v1465_v9, %v1462_v7  ;;  %v2229_v12 = vpop.f32.mrb[3].mxu1 }
 0x59b   : > { %2235 = vmatmul.mubr.msk.bf16.vlgmr.msra.gmra.mrb[20].mxu0 %vm796_vm2, %v1471_v10 }
 0x59c   : > { %2242 = vmatprep.mubr.msk.bf16.mxu0 %vm2427_vm4, %v2426_v11  ;;  %2239 = vmatpush3.bf16.msra.mxu0 %v2328_v32 }
 0x59d   : > { %2240 = vmatprep.subr.bf16.mxu0 %v2426_v11 }
 0x5a0   : > { %2241 = vmatpush3.bf16.msra.mxu0 %v2329_v33 }
 0x66e   : > { %v1532_v14 = vpop.f32.mrb[20].mxu0 }
 0x66f   : > { %v1533_v22 = vadd.f32 %v2108_v13, %v1532_v14  ;;  %v2236_v16 = vpop.f32.mrb[21].mxu0 }
 0x670   : > { %v1535_v18 = vpop.f32.mrb[22].mxu0 }
 0x671   : > { %v1546_v21 = vmul.f32 %v2112_v15, %v1533_v22  ;;  %v1536_v23 = vadd.f32 %v2108_v13, %v1535_v18  ;;  %v2237_v24 = vpop.f32.mrb[23].mxu0 }
 0x673   : > { %v2813_v25 = vadd.f32 %v1546_v21, %v2629_v2  ;;  %v1547_v26 = vmul.f32 %v2112_v15, %v1536_v23 }
 0x675   : > { %v2816_v27 = vadd.f32 %v1547_v26, %v2631_v3  ;;  %v1552_v28 = vsel %vm796_vm2, %v2813_v25, 0.0  ;;  %v1560_v29 = vmul.f32 %v2813_v25, %v2813_v25 }
 0x676   : > { %1553 = vadd.xlane.f32.xlu0 %v1552_v28 }
 0x677   : > { %v1555_v30 = vsel %vm800_vm3, %v2816_v27, 0.0  ;;  %v1562_v31 = vsel %vm796_vm2, %v1560_v29, 0.0  ;;  %v1561_v2 = vmul.f32 %v2816_v27, %v2816_v27 }
 0x678   : > { %1556 = vadd.xlane.f32.xlu1 %v1555_v30 }
 0x679   : > { %v1565_v3 = vsel %vm800_vm3, %v1561_v2, 0.0 }
 0x67a   : > { %1563 = vadd.xlane.f32.xlu0 %v1562_v31 }
 0x67e   : > { %1566 = vadd.xlane.f32.xlu0 %v1565_v3 }
 0x703   : > { %v1554_v34 = vpop.xlane.xlu0 %1553 }
 0x704   : > { %v1558_v35 = vmul.f32 0.03125, %v1554_v34 }
 0x705   : > { %v1557_v36 = vpop.xlane.xlu1 %1556 }
 0x706   : > { %v1570_v38 = vmul.f32 %v1558_v35, %v1558_v35  ;;  %v1559_v39 = vmul.f32 0.03125, %v1557_v36  ;;  %v1576_v48 = vsub.f32 %v2813_v25, %v1558_v35  ;;  %v2119_v35 = vld [vmem:[%s772_s2] ss:$0 sm:$0xff]  ;;  %s2968_s2 = sld [smem:[#allocation3_spill]] }
 0x707   : > { %v1564_v37 = vpop.xlane.xlu0 %1563 }
 0x708   : > { %v1568_v40 = vmul.f32 0.03125, %v1564_v37  ;;  %v1571_v43 = vmul.f32 %v1559_v39, %v1559_v39  ;;  %v1577_v17 = vsub.f32 %v2816_v27, %v1559_v39  ;;  %v2128_v37 = vld [vmem:[%s775_s19] ss:$0 sm:$0xff] }
 0x70a   : > { %v1572_v41 = vsub.f32 %v1568_v40, %v1570_v38 }
 0x70b   : > { %v1567_v42 = vpop.xlane.xlu0 %1566 }
 0x70c   : > { %v1574_v44 = vmax.f32 %v1572_v41, 0.0  ;;  %v1569_v45 = vmul.f32 0.03125, %v1567_v42  ;;  %p2129_p8 = scmp.ne.s32.totalorder %s2968_s2, 1 }
 0x70d   : > { %s2969_s1 = sld [smem:[#allocation17_spill]] (!%p2129_p8)  ;;  %s2970_s22 = sld [smem:[#allocation18_spill]] (!%p2129_p8) }
 0x70e   : > { %v1578_v62 = vadd.f32 1e-06, %v1574_v44  ;;  %v1573_v46 = vsub.f32 %v1569_v45, %v1571_v43 }
 0x710   : > { %2374 = vrsqrt.f32 %v1578_v62  ;;  %v1575_v19 = vmax.f32 %v1573_v46, 0.0 }
 0x712   : > { %v1579_v47 = vadd.f32 1e-06, %v1575_v19 }
 0x713   : > { %v2130_v4 = vld [vmem:[%s2969_s1] ss:$0 sm:$0xff] (!%p2129_p8) }
 0x714   : > { %2376 = vrsqrt.f32 %v1579_v47 }
 0x71a   : > { %v2375_v20 = vpop.eup %2374 }
 0x71b   : > { %v1582_v49 = vmul.f32 %v2375_v20, %v1576_v48 }
 0x71d   : > { %v1590_v54 = vmul.f32 %v2113_v50, %v1582_v49 }
 0x71e   : > { %v2377_v51 = vpop.eup %2376 }
 0x71f   : > { %v1583_v52 = vmul.f32 %v2377_v51, %v1577_v17  ;;  %v1598_v57 = vadd.f32 %v2114_v55, %v1590_v54 }
 0x721   : > { %v1591_v56 = vmul.f32 %v2113_v50, %v1583_v52 }
 0x723   : > { %v1599_v58 = vadd.f32 %v2114_v55, %v1591_v56 }
 0x725   : > { %v1600_v53 = vpack.c.bf16 %v1599_v58, %v1598_v57 }
 0x727   : > { %2243 = vmatmul.mubr.msk.bf16.vlgmr.msra.gmra.mrb[24].mxu0 %vm796_vm2, %v1600_v53 }
 0x7fa   : > { %v1661_v7 = vpop.f32.mrb[24].mxu0 }
 0x7fb   : > { %v1662_v8 = vadd.f32 %v2115_v6, %v1661_v7  ;;  %v2244_v9 = vpop.f32.mrb[25].mxu0 }
 0x7fc   : > { %v1664_v10 = vpop.f32.mrb[26].mxu0 }
 0x7fd   : > { %v1670_v12 = vmul.f32 0.044715, %v1662_v8  ;;  %v1665_v13 = vadd.f32 %v2115_v6, %v1664_v10  ;;  %v2245_v14 = vpop.f32.mrb[27].mxu0  ;;  %v1668_v31 = vmul.f32 0.5, %v1662_v8  ;;  %v2131_v6 = vld [vmem:[%s2970_s22] ss:$0 sm:$0xff] (!%p2129_p8) }
 0x7ff   : > { %v1672_v15 = vmul.f32 %v1670_v12, %v1662_v8  ;;  %v1671_v22 = vmul.f32 0.044715, %v1665_v13  ;;  %v1669_v2 = vmul.f32 0.5, %v1665_v13 }
 0x801   : > { %v1674_v16 = vmul.f32 %v1672_v15, %v1662_v8  ;;  %v1673_v18 = vmul.f32 %v1671_v22, %v1665_v13 }
 0x803   : > { %v1676_v21 = vadd.f32 %v1674_v16, %v1662_v8  ;;  %v1675_v23 = vmul.f32 %v1673_v18, %v1665_v13 }
 0x805   : > { %v1678_v11 = vmul.f32 0.7978846, %v1676_v21  ;;  %v1677_v24 = vadd.f32 %v1675_v23, %v1665_v13 }
 0x807   : > { %2378 = vtanh.f32 %v1678_v11  ;;  %v1679_v26 = vmul.f32 0.7978846, %v1677_v24 }
 0x809   : > { %2380 = vtanh.f32 %v1679_v26 }
 0x811   : > { %v2379_v28 = vpop.eup %2378 }
 0x812   : > { %v1682_v29 = vadd.f32 1.0, %v2379_v28 }
 0x813   : > { %v2381_v30 = vpop.eup %2380 }
 0x814   : > { %v1683_v3 = vadd.f32 1.0, %v2381_v30  ;;  %v1684_v32 = vmul.f32 %v1682_v29, %v1668_v31 }
 0x816   : > { %v1685_v33 = vmul.f32 %v1683_v3, %v1669_v2 }
 0x818   : > { %v1686_v34 = vpack.c.bf16 %v1685_v33, %v1684_v32 }
 0x81a   : > { %2263 = vmatmul.mubr.bf16.vlgmr.msra.gmra.mrb[4].mxu1 %v1686_v34 }
 0x8ed   : > { %v1792_v36 = vpop.f32.mrb[4].mxu1 }
 0x8ee   : > { %v1793_v38 = vadd.f32 %v2119_v35, %v1792_v36  ;;  %v2264_v39 = vpop.f32.mrb[5].mxu1 }
 0x8ef   : > { %v1795_v40 = vpop.f32.mrb[6].mxu1 }
 0x8f0   : > { %v1806_v41 = vmul.f32 %v2128_v37, %v1793_v38  ;;  %v1796_v42 = vadd.f32 %v2119_v35, %v1795_v40  ;;  %v2265_v43 = vpop.f32.mrb[7].mxu1  ;;  %1815 = sbr.rel (%p2129_p8) target bundleno = 2467 (0x9a3), region = 96 }
 0x8f2   : > { %v1808_v44 = vadd.f32 %v1806_v41, %v2813_v25  ;;  %v1807_v45 = vmul.f32 %v2128_v37, %v1796_v42 }
 0x8f4   : > { %1810 = vst.msk [vmem:[#allocation2] sm:$0xff] %vm796_vm2, %v1808_v44  ;;  %v1809_v62 = vadd.f32 %v1807_v45, %v2816_v27  ;;  %v1818_v46 = vsel (!%p2129_p8), %vm796_vm2, %v1808_v44, 0.0  ;;  %v1826_v19 = vmul.f32 (!%p2129_p8), %v1808_v44, %v1808_v44 }
 0x8f5   : > { %1819 = vadd.xlane.f32.xlu0 (!%p2129_p8), %v1818_v46 }
 0x8f6   : > { %1811 = vst.msk [vmem:[#allocation2 + $0x8] sm:$0x1] %vm800_vm3, %v1809_v62  ;;  %v1827_v47 = vmul.f32 (!%p2129_p8), %v1809_v62, %v1809_v62  ;;  %v1828_v48 = vsel (!%p2129_p8), %vm796_vm2, %v1826_v19, 0.0  ;;  %v1821_v20 = vsel (!%p2129_p8), %vm800_vm3, %v1809_v62, 0.0 }
 0x8f7   : > { %1829 = vadd.xlane.f32.xlu1 %v1828_v48 }
 0x8f8   : > { %v1831_v25 = vsel %vm800_vm3, %v1827_v47, 0.0 }
 0x8f9   : > { %1822 = vadd.xlane.f32.xlu0 %v1821_v20 }
 0x8fb   : > { %1832 = vadd.xlane.f32.xlu1 %v1831_v25 }
 0x982   : > { %v1820_v27 = vpop.xlane.xlu0 %1819 }
 0x983   : > { %v1824_v49 = vmul.f32 0.03125, %v1820_v27 }
 0x984   : > { %v1830_v50 = vpop.xlane.xlu1 %1829 }
 0x985   : > { %v1836_v17 = vmul.f32 %v1824_v49, %v1824_v49  ;;  %v1834_v51 = vmul.f32 0.03125, %v1830_v50  ;;  %v1842_v0 = vsub.f32 %v1808_v44, %v1824_v49 }
 0x986   : > { %v1823_v52 = vpop.xlane.xlu0 %1822 }
 0x987   : > { %v1838_v54 = vsub.f32 %v1834_v51, %v1836_v17  ;;  %v1825_v55 = vmul.f32 0.03125, %v1823_v52 }
 0x988   : > { %v1833_v56 = vpop.xlane.xlu1 %1832 }
 0x989   : > { %v1840_v57 = vmax.f32 %v1838_v54, 0.0  ;;  %v1837_v58 = vmul.f32 %v1825_v55, %v1825_v55  ;;  %v1835_v53 = vmul.f32 0.03125, %v1833_v56  ;;  %v1843_v8 = vsub.f32 %v1809_v62, %v1825_v55 }
 0x98b   : > { %v1844_v59 = vadd.f32 1e-06, %v1840_v57  ;;  %v1839_v60 = vsub.f32 %v1835_v53, %v1837_v58 }
 0x98d   : > { %2382 = vrsqrt.f32 %v1844_v59  ;;  %v1841_v61 = vmax.f32 %v1839_v60, 0.0 }
 0x98f   : > { %v1845_v63 = vadd.f32 1e-06, %v1841_v61 }
 0x991   : > { %2384 = vrsqrt.f32 %v1845_v63 }
 0x997   : > { %v2383_v1 = vpop.eup %2382 }
 0x998   : > { %v1848_v5 = vmul.f32 %v2383_v1, %v1842_v0 }
 0x99a   : > { %v1856_v7 = vmul.f32 %v2130_v4, %v1848_v5 }
 0x99b   : > { %v2385_v9 = vpop.eup %2384 }
 0x99c   : > { %v1864_v10 = vadd.f32 %v2131_v6, %v1856_v7  ;;  %v1849_v12 = vmul.f32 %v2385_v9, %v1843_v8 }
 0x99e   : > { %1866 = vst.msk [vmem:[%s2626_s9] sm:$0xff] %vm796_vm2, %v1864_v10  ;;  %v1857_v13 = vmul.f32 %v2130_v4, %v1849_v12 }
 0x9a0   : > { %v1865_v14 = vadd.f32 %v2131_v6, %v1857_v13 }
 0x9a2   : > { %1867 = vst.msk [vmem:[%s2626_s9 + $0x8] sm:$0x1] %vm800_vm3, %v1865_v14 }
 0x9a3 PF: > { %s2971_s10 = sld [smem:[#allocation6_spill]]  ;;  %s2972_s24 = sld [smem:[#allocation4_spill]] }
 0x9a4   : > { %s2973_s25 = sld [smem:[#allocation5_spill]]  ;;  %s2974_s26 = sld [smem:[#allocation7_spill]] }
 0x9a5   : > { %s2975_s27 = sld [smem:[#allocation8_spill]] }
 0x9a9   : > { %s27_s28 = sadd.s32 1, %s2971_s10  }
 0x9aa   : > { %p24_p9 = scmp.ge.s32.totalorder %s27_s28, 6  }
 0x9ac   :  { %26 = sbr.rel (!%p24_p9) target bundleno = 12 (0xc), region = 168 }

</bundles_post_ra>
